<compile_context>
chip_gen: v6e
topology: v6e:2x2x1
jax: 0.10.0
libtpu: 0.0.40
codegen_flags: <defaults>
</compile_context>

<pallas_src>
import numpy as np
import jax
import jax.numpy as jnp
from jax import lax
from jax.experimental import pallas as pl
from jax.experimental.pallas import tpu as pltpu


# ----------------------------- Pallas kernel --------------------------------

def gru_recurrence_kernel(gi_ref, m_ref, h0_ref, whh_ref, bhn_ref,
                          y_ref, hout_ref, h_scr):
    """One (batch block, time chunk) grid step of the sequential GRU recurrence.

    gi_ref:   (TILE_T, Bt, 3*Hp)  x_t @ W_ih with b_ih (all gates) and b_hh (r,z)
                                  folded in; gate slices lane-aligned.
    m_ref:    (TILE_T, Bt, 1)     per-step update mask (lane broadcast done in-kernel).
    h0_ref:   (Bt, Hp)            premasked, zero-padded initial hidden.
    whh_ref:  (Hp, 3*Hp)          fused, zero-padded hidden->gates weight.
    bhn_ref:  (1, Hp)             hidden bias of the n gate (stays inside r*(.)).
    y_ref:    (TILE_T, Bt, Hp)    GRU output per step (lane-dense, padded).
    hout_ref: (Bt, Hp)            final carried hidden (written at last time chunk).
    h_scr:    (Bt, Hp) VMEM       hidden carried across time chunks.
    """
    t_blk = pl.program_id(1)          # time-chunk index (grid = (batch, time))
    TILE_T = gi_ref.shape[0]
    Bt, Hp = h0_ref.shape

    @pl.when(t_blk == 0)
    def _():                          # (re)start the recurrence for this batch block
        h_scr[...] = h0_ref[...]

    # Hoisted once per kernel invocation (not per unrolled step):
    #   - the fused hidden->gates weight (MXU RHS),
    #   - the n-gate hidden-bias sublane broadcast (JAX does not CSE broadcast_in_dim).
    whh = whh_ref[...]
    bhn = jnp.broadcast_to(bhn_ref[...], (Bt, Hp))

    def step(t, h):
        gi = gi_ref[t]                                            # (Bt, 3*Hp)
        # Single fused hidden-projection matmul per step (MXU), f32 accumulate.
        # NOTE: default MXU precision is bf16-input; fine at these tolerances.
        gh = jnp.dot(h, whh, preferred_element_type=jnp.float32)
        r = jax.nn.sigmoid(gi[:, 0:Hp] + gh[:, 0:Hp])
        z = jax.nn.sigmoid(gi[:, Hp:2 * Hp] + gh[:, Hp:2 * Hp])
        n = jnp.tanh(gi[:, 2 * Hp:3 * Hp] + r * (gh[:, 2 * Hp:3 * Hp] + bhn))
        nh = (1.0 - z) * n + z * h                                # GRU cell output
        y_ref[t] = nh
        m = m_ref[t]                                              # (Bt, 1)
        return h + m * (nh - h)                                   # masked carry (FMA)

    h_scr[...] = lax.fori_loop(0, TILE_T, step, h_scr[...], unroll=True)

    @pl.when(t_blk == pl.num_programs(1) - 1)
    def _():
        hout_ref[...] = h_scr[...]


# ------------------------ parameter packing / wrapper ------------------------

def pack_gru_params(params, Hp):
    """Fuse per-gate weights into lane-aligned, zero-padded slabs.

    Layout: gate g occupies lanes [g*Hp, g*Hp + H) of the 3*Hp gate axis.
    b_pre folds b_ih (all gates) + b_hh (r and z only); b_hn stays separate because
    the n gate needs r * (h @ W_hn + b_hn).

    Padding-lane invariant (do NOT break): padded lanes of h0, of every gate slab and
    of both biases are exactly 0, so at padded lanes r = z = 0.5, n = 0 and the carried
    hidden stays exactly 0 forever (sliced off in the wrapper).
    """
    wih, whh, bih, bhh = params["wih"], params["whh"], params["bih"], params["bhh"]
    I, H = wih.shape[1], wih.shape[2]
    wih_f = jnp.zeros((I, 3 * Hp), jnp.float32)
    whh_f = jnp.zeros((Hp, 3 * Hp), jnp.float32)
    for g in range(3):
        wih_f = wih_f.at[:, g * Hp:g * Hp + H].set(wih[g])
        whh_f = whh_f.at[:H, g * Hp:g * Hp + H].set(whh[g])
    b_pre = jnp.zeros((1, 3 * Hp), jnp.float32)
    b_pre = b_pre.at[:, 0 * Hp:0 * Hp + H].set(bih[0] + bhh[0])   # r
    b_pre = b_pre.at[:, 1 * Hp:1 * Hp + H].set(bih[1] + bhh[1])   # z
    b_pre = b_pre.at[:, 2 * Hp:2 * Hp + H].set(bih[2])            # n (input bias only)
    b_hn = jnp.zeros((1, Hp), jnp.float32).at[:, :H].set(bhh[2])
    return wih_f, whh_f, b_pre, b_hn


def _choose_batch_tile(B, cap=64):
    """Cap rows per block (vreg pressure / v7x two-TC batch parallelism)."""
    if B <= cap:
        return B
    for bt in range(cap - cap % 8, 7, -8):
        if B % bt == 0:
            return bt
    return B


def _choose_time_tile(T, B_tile, Hp, budget_bytes=4 << 20, max_unroll=8):
    """Size the time chunk against an explicit double-buffered VMEM budget (v7x-safe)."""
    per_step = B_tile * (3 * Hp + Hp + 1) * 4 * 2   # gi + y + mask, double-buffered, f32
    return int(max(1, min(T, budget_bytes // per_step, max_unroll)))


def gru_sequence_pallas(params, x_tbi, mask_tb1, premask_b1, h0_bh):
    T, B, I = x_tbi.shape
    H = h0_bh.shape[-1]
    Hp = ((H + 127) // 128) * 128                     # lane-dense gate/output width

    wih_f, whh_f, b_pre, b_hn = pack_gru_params(params, Hp)

    B_tile = _choose_batch_tile(B)
    TILE_T = _choose_time_tile(T, B_tile, Hp)
    Tp = ((T + TILE_T - 1) // TILE_T) * TILE_T        # pad time to a whole # of chunks

    if Tp != T:
        # Padded steps carry a zero update mask -> hidden untouched; padded y sliced off.
        x_tbi = jnp.pad(x_tbi, ((0, Tp - T), (0, 0), (0, 0)))
        mask_tb1 = jnp.pad(mask_tb1, ((0, Tp - T), (0, 0), (0, 0)))

    # Hoisted input projection for ALL steps: one (Tp*B, I) @ (I, 3*Hp) matmul in plain
    # XLA, with all foldable biases pre-added.
    gi = (x_tbi.reshape(Tp * B, I) @ wih_f + b_pre).reshape(Tp, B, 3 * Hp)

    h0p = jnp.pad(h0_bh * premask_b1, ((0, 0), (0, Hp - H)))      # premask + zero-pad

    nb, nt = B // B_tile, Tp // TILE_T

    y, h_out = pl.pallas_call(
        gru_recurrence_kernel,
        out_shape=(
            jax.ShapeDtypeStruct((Tp, B, Hp), jnp.float32),
            jax.ShapeDtypeStruct((B, Hp), jnp.float32),
        ),
        grid_spec=pltpu.PrefetchScalarGridSpec(
            num_scalar_prefetch=0,
            grid=(nb, nt),                                           # (batch, time)
            in_specs=[
                pl.BlockSpec((TILE_T, B_tile, 3 * Hp), lambda b, t: (t, b, 0)),  # gi
                pl.BlockSpec((TILE_T, B_tile, 1), lambda b, t: (t, b, 0)),       # mask
                pl.BlockSpec((B_tile, Hp), lambda b, t: (b, 0)),                 # h0
                pl.BlockSpec((Hp, 3 * Hp), lambda b, t: (0, 0)),                 # W_hh
                pl.BlockSpec((1, Hp), lambda b, t: (0, 0)),                      # b_hn
            ],
            out_specs=[
                pl.BlockSpec((TILE_T, B_tile, Hp), lambda b, t: (t, b, 0)),      # y
                pl.BlockSpec((B_tile, Hp), lambda b, t: (b, 0)),                 # h_out
            ],
            scratch_shapes=[pltpu.VMEM((B_tile, Hp), jnp.float32)],  # carried hidden
        ),
        compiler_params=pltpu.CompilerParams(
            dimension_semantics=("parallel", "arbitrary"),
            vmem_limit_bytes=32 * 1024 * 1024,
        ),
    )(gi, mask_tb1, h0p, whh_f, b_hn)

    return y[:T, :, :H], h_out[:, :H]                 # strip time padding + lane padding


# ------------------------- RecurrentBlock wrapper ----------------------------

def init_gru_params(key, input_size, hidden_size):
    """Deterministic GRU parameters, PyTorch-style U(-1/sqrt(H), 1/sqrt(H)) init."""
    k = 1.0 / np.sqrt(hidden_size)
    k0, k1, k2, k3 = jax.random.split(key, 4)
    return dict(
        wih=jax.random.uniform(k0, (3, input_size, hidden_size), jnp.float32, -k, k),
        whh=jax.random.uniform(k1, (3, hidden_size, hidden_size), jnp.float32, -k, k),
        bih=jax.random.uniform(k2, (3, 1, hidden_size), jnp.float32, -k, k),
        bhh=jax.random.uniform(k3, (3, 1, hidden_size), jnp.float32, -k, k),
    )


def gru_cell_jax(params, x, h):
    """One PyTorch-semantics GRU cell step (pure JAX)."""
    wih, whh, bih, bhh = params["wih"], params["whh"], params["bih"], params["bhh"]
    r = jax.nn.sigmoid(x @ wih[0] + bih[0] + h @ whh[0] + bhh[0])
    z = jax.nn.sigmoid(x @ wih[1] + bih[1] + h @ whh[1] + bhh[1])
    n = jnp.tanh(x @ wih[2] + bih[2] + r * (h @ whh[2] + bhh[2]))
    return (1.0 - z) * n + z * h


def gru_all_steps_from_h0_jax(params, x_tbi, h0):
    """mask=None fast path: every step uses the SAME initial hidden (no serial chain)."""
    wih, whh, bih, bhh = params["wih"], params["whh"], params["bih"], params["bhh"]
    gh_r = h0 @ whh[0] + bhh[0]                       # (B,H) computed once
    gh_z = h0 @ whh[1] + bhh[1]
    gh_n = h0 @ whh[2] + bhh[2]
    r = jax.nn.sigmoid(x_tbi @ wih[0] + bih[0] + gh_r)
    z = jax.nn.sigmoid(x_tbi @ wih[1] + bih[1] + gh_z)
    n = jnp.tanh(x_tbi @ wih[2] + bih[2] + r * gh_n)
    return (1.0 - z) * n + z * h0                     # (T,B,H)


def recurrent_block_forward(params, inputs, states=None, seq_len=None, mask=None):
    """Mirror of RecurrentBlock.forward.

    inputs: (N, input_size) batch-first (N = B when seq_len is None else B*seq_len)
    states: (B, num_layers=1, H) batch-first hidden or None
    mask:   (B, seq_len, 1, 1) float mask (1 = update state) or None
    returns (x_out, state_out) with x_out (N, H), state_out (B, 1, H)
    """
    I = params["wih"].shape[1]
    H = params["wih"].shape[2]

    if seq_len is None:
        B = inputs.shape[0]
        if states is None:
            states = jnp.zeros((B, 1, H), jnp.float32)
        h0 = states[:, 0, :]
        # Single (B,I)x(I,H) GRU cell: pure dispatch overhead for a pallas_call -> XLA.
        nh = gru_cell_jax(params, inputs, h0)
        return nh, nh[:, None, :]

    B = inputs.shape[0] // seq_len
    if states is None:
        states = jnp.zeros((B, 1, H), jnp.float32)
    h0 = states[:, 0, :]
    x_tbi = jnp.transpose(inputs.reshape(B, seq_len, I), (1, 0, 2))

    if mask is None:
        # HandyRL/PyTorch: with no mask the hidden is NEVER carried between steps and
        # the returned state is the untouched initial state. No serial recurrence at
        # all -> one batched elementwise pass (per perf review).
        y_tbh = gru_all_steps_from_h0_jax(params, x_tbi, h0)
        x_out = jnp.transpose(y_tbh, (1, 0, 2)).reshape(B * seq_len, H)
        return x_out, states

    m = mask.reshape(B, seq_len).astype(jnp.float32)
    mask_tb1 = jnp.transpose(m, (1, 0))[:, :, None]               # (T, B, 1) — slim
    premask = m[:, 0][:, None]
    y, h_out = gru_sequence_pallas(params, x_tbi, mask_tb1, premask, h0)
    x_out = jnp.transpose(y, (1, 0, 2)).reshape(B * seq_len, H)
    return x_out, h_out[:, None, :]


# --------------------------- pure-JAX reference -------------------------------

def gru_sequence_ref(params, x_tbi, mask_tb1, premask_b1, h0_bh):
    def step(h, xm):
        x, m = xm
        nh = gru_cell_jax(params, x, h)
        return h * (1.0 - m) + nh * m, nh

    h_last, ys = lax.scan(step, h0_bh * premask_b1, (x_tbi, mask_tb1))
    return ys, h_last


# ----------------------------------- main -------------------------------------

if __name__ == "__main__":
    B, T, I, H = 2, 8, 16, 32
    key = jax.random.PRNGKey(0)
    kp, kx, kh, km, kx1, kx2, km2 = jax.random.split(key, 7)

    params = init_gru_params(kp, I, H)

    # --- masked sequence (training-style), T divisible by the time tile -----------
    inputs_seq = jax.random.normal(kx, (B * T, I), jnp.float32)
    states = jax.random.normal(kh, (B, 1, H), jnp.float32)
    mask = (jax.random.uniform(km, (B, T, 1, 1)) > 0.3).astype(jnp.float32)

    x_out, state_out = recurrent_block_forward(
        params, inputs_seq, states=states, seq_len=T, mask=mask)
    jax.block_until_ready((x_out, state_out))

    x_tbi = jnp.transpose(inputs_seq.reshape(B, T, I), (1, 0, 2))
    m2 = mask.reshape(B, T)
    mask_tb1 = jnp.transpose(m2, (1, 0))[:, :, None]
    premask = m2[:, 0][:, None]
    y_ref, h_ref = gru_sequence_ref(params, x_tbi, mask_tb1, premask, states[:, 0, :])
    x_ref = jnp.transpose(y_ref, (1, 0, 2)).reshape(B * T, H)
    np.testing.assert_allclose(np.asarray(x_out), np.asarray(x_ref), rtol=2e-3, atol=2e-3)
    np.testing.assert_allclose(np.asarray(state_out[:, 0, :]), np.asarray(h_ref),
                               rtol=2e-3, atol=2e-3)

    # --- masked sequence with T NOT divisible by the time tile (chunked grid + pad) ---
    T2 = 20
    inputs_seq2 = jax.random.normal(kx2, (B * T2, I), jnp.float32)
    mask2 = (jax.random.uniform(km2, (B, T2, 1, 1)) > 0.3).astype(jnp.float32)
    x_out2, state_out2 = recurrent_block_forward(
        params, inputs_seq2, states=states, seq_len=T2, mask=mask2)
    jax.block_until_ready((x_out2, state_out2))

    x_tbi2 = jnp.transpose(inputs_seq2.reshape(B, T2, I), (1, 0, 2))
    m2b = mask2.reshape(B, T2)
    mask_tb1_2 = jnp.transpose(m2b, (1, 0))[:, :, None]
    premask2 = m2b[:, 0][:, None]
    y_ref2, h_ref2 = gru_sequence_ref(params, x_tbi2, mask_tb1_2, premask2, states[:, 0, :])
    x_ref2 = jnp.transpose(y_ref2, (1, 0, 2)).reshape(B * T2, H)
    np.testing.assert_allclose(np.asarray(x_out2), np.asarray(x_ref2), rtol=2e-3, atol=2e-3)
    np.testing.assert_allclose(np.asarray(state_out2[:, 0, :]), np.asarray(h_ref2),
                               rtol=2e-3, atol=2e-3)

    # --- mask=None: hidden never carried; state_out == initial states (XLA fast path) ---
    x_out_nm, state_out_nm = recurrent_block_forward(
        params, inputs_seq, states=states, seq_len=T, mask=None)
    jax.block_until_ready((x_out_nm, state_out_nm))
    y_ref_nm, _ = gru_sequence_ref(
        params, x_tbi, jnp.zeros((T, B, 1), jnp.float32),
        jnp.ones((B, 1), jnp.float32), states[:, 0, :])
    x_ref_nm = jnp.transpose(y_ref_nm, (1, 0, 2)).reshape(B * T, H)
    np.testing.assert_allclose(np.asarray(x_out_nm), np.asarray(x_ref_nm),
                               rtol=2e-3, atol=2e-3)
    np.testing.assert_allclose(np.asarray(state_out_nm), np.asarray(states), rtol=0, atol=0)

    # --- single-step (inference-style) call: seq_len=None ------------------------------
    inputs_one = jax.random.normal(kx1, (B, I), jnp.float32)
    x1, s1 = recurrent_block_forward(params, inputs_one, states=states)
    jax.block_until_ready((x1, s1))
    h1_ref = gru_cell_jax(params, inputs_one, states[:, 0, :])
    np.testing.assert_allclose(np.asarray(x1), np.asarray(h1_ref), rtol=1e-3, atol=1e-3)
    np.testing.assert_allclose(np.asarray(s1[:, 0, :]), np.asarray(h1_ref),
                               rtol=1e-3, atol=1e-3)

    print("KERNEL_OK")
</pallas_src>

<mosaic_0001>
module attributes {stable_mosaic.version = 11 : i64} {
  func.func @gru_recurrence_kernel(%arg0: i32, %arg1: i32, %arg2: memref<8x2x384xf32, #tpu.memory_space<vmem>>, %arg3: memref<8x2x1xf32, #tpu.memory_space<vmem>>, %arg4: memref<2x128xf32, #tpu.memory_space<vmem>>, %arg5: memref<128x384xf32, #tpu.memory_space<vmem>>, %arg6: memref<1x128xf32, #tpu.memory_space<vmem>>, %arg7: memref<8x2x128xf32, #tpu.memory_space<vmem>>, %arg8: memref<2x128xf32, #tpu.memory_space<vmem>>, %arg9: memref<2x128xf32, #tpu.memory_space<vmem>>) attributes {dimension_semantics = [#tpu.dimension_semantics<parallel>, #tpu.dimension_semantics<arbitrary>], iteration_bounds = array<i64: 1, 1>, scalar_prefetch = 0 : i64, scratch_operands = 1 : i64, tpu.core_type = #tpu.core_type<tc>, window_params = [{transform_indices = @transform_0, window_bounds = array<i64: 8, 2, 384>}, {transform_indices = @transform_1, window_bounds = array<i64: 8, 2, 1>}, {transform_indices = @transform_2, window_bounds = array<i64: 2, 128>}, {pipeline_mode = #tpu.pipeline_mode<synchronous>, transform_indices = @transform_3, window_bounds = array<i64: 128, 384>}, {pipeline_mode = #tpu.pipeline_mode<synchronous>, transform_indices = @transform_4, window_bounds = array<i64: 1, 128>}, {transform_indices = @transform_5, window_bounds = array<i64: 8, 2, 128>}, {transform_indices = @transform_6, window_bounds = array<i64: 2, 128>}]} {
    %c0_i32 = arith.constant 0 : i32
    %0 = arith.cmpi eq, %arg1, %c0_i32 : i32
    %1 = arith.extui %0 : i1 to i32
    %c0_i32_0 = arith.constant 0 : i32
    %2 = arith.cmpi ne, %1, %c0_i32_0 : i32
    scf.if %2 {
      %c0_90 = arith.constant 0 : index
      %c0_91 = arith.constant 0 : index
      %348 = vector.load %arg4[%c0_90, %c0_91] : memref<2x128xf32, #tpu.memory_space<vmem>>, vector<2x128xf32>
      %c0_92 = arith.constant 0 : index
      %c0_93 = arith.constant 0 : index
      %349 = vector.load %arg9[%c0_92, %c0_93] : memref<2x128xf32, #tpu.memory_space<vmem>>, vector<2x128xf32>
      tpu.vector_store %arg9[%c0_92, %c0_93], %348 {strides = array<i32>} : memref<2x128xf32, #tpu.memory_space<vmem>>, vector<2x128xf32>,
    } else {
    }
    %c0 = arith.constant 0 : index
    %c0_1 = arith.constant 0 : index
    %3 = vector.load %arg5[%c0, %c0_1] : memref<128x384xf32, #tpu.memory_space<vmem>>, vector<128x384xf32>
    %c0_2 = arith.constant 0 : index
    %c0_3 = arith.constant 0 : index
    %4 = vector.load %arg6[%c0_2, %c0_3] : memref<1x128xf32, #tpu.memory_space<vmem>>, vector<1x128xf32>
    %5 = vector.shape_cast %4 : vector<1x128xf32> to vector<1x128xf32>
    %6 = vector.broadcast %5 : vector<1x128xf32> to vector<2x128xf32>
    %c0_4 = arith.constant 0 : index
    %c0_5 = arith.constant 0 : index
    %7 = vector.load %arg9[%c0_4, %c0_5] : memref<2x128xf32, #tpu.memory_space<vmem>>, vector<2x128xf32>
    %c0_i32_6 = arith.constant 0 : i32
    %8 = arith.index_cast %c0_i32_6 : i32 to index
    %c0_7 = arith.constant 0 : index
    %c0_8 = arith.constant 0 : index
    %9 = vector.load %arg2[%8, %c0_7, %c0_8] : memref<8x2x384xf32, #tpu.memory_space<vmem>>, vector<1x2x384xf32>
    %10 = vector.shape_cast %9 : vector<1x2x384xf32> to vector<2x384xf32>
    %cst = arith.constant dense<0.000000e+00> : vector<2x384xf32>
    %11 = tpu.matmul %7, %3, %cst {dimension_numbers = #tpu.dot_dimension_numbers<[1], [0], [0], [1], [0, 0, 1, 1], [], []>} : vector<2x128xf32>, vector<128x384xf32>, vector<2x384xf32> -> vector<2x384xf32>
    %12 = vector.extract_strided_slice %10 {offsets = [0, 0], sizes = [2, 128], strides = [1, 1]} : vector<2x384xf32> to vector<2x128xf32>
    %13 = vector.extract_strided_slice %11 {offsets = [0, 0], sizes = [2, 128], strides = [1, 1]} : vector<2x384xf32> to vector<2x128xf32>
    %14 = arith.addf %12, %13 : vector<2x128xf32>
    %15 = arith.negf %14 : vector<2x128xf32>
    %16 = math.exp %15 : vector<2x128xf32>
    %cst_9 = arith.constant 1.000000e+00 : f32
    %17 = vector.broadcast %cst_9 : f32 to vector<2x128xf32>
    %18 = arith.addf %17, %16 : vector<2x128xf32>
    %19 = arith.divf %17, %18 : vector<2x128xf32>
    %20 = vector.extract_strided_slice %10 {offsets = [0, 128], sizes = [2, 128], strides = [1, 1]} : vector<2x384xf32> to vector<2x128xf32>
    %21 = vector.extract_strided_slice %11 {offsets = [0, 128], sizes = [2, 128], strides = [1, 1]} : vector<2x384xf32> to vector<2x128xf32>
    %22 = arith.addf %20, %21 : vector<2x128xf32>
    %23 = arith.negf %22 : vector<2x128xf32>
    %24 = math.exp %23 : vector<2x128xf32>
    %cst_10 = arith.constant 1.000000e+00 : f32
    %25 = vector.broadcast %cst_10 : f32 to vector<2x128xf32>
    %26 = arith.addf %25, %24 : vector<2x128xf32>
    %27 = arith.divf %25, %26 : vector<2x128xf32>
    %28 = vector.extract_strided_slice %10 {offsets = [0, 256], sizes = [2, 128], strides = [1, 1]} : vector<2x384xf32> to vector<2x128xf32>
    %29 = vector.extract_strided_slice %11 {offsets = [0, 256], sizes = [2, 128], strides = [1, 1]} : vector<2x384xf32> to vector<2x128xf32>
    %30 = arith.addf %29, %6 : vector<2x128xf32>
    %31 = arith.mulf %19, %30 : vector<2x128xf32>
    %32 = arith.addf %28, %31 : vector<2x128xf32>
    %33 = math.tanh %32 : vector<2x128xf32>
    %cst_11 = arith.constant 1.000000e+00 : f32
    %34 = vector.broadcast %cst_11 : f32 to vector<2x128xf32>
    %35 = arith.subf %34, %27 : vector<2x128xf32>
    %36 = arith.mulf %35, %33 : vector<2x128xf32>
    %37 = arith.mulf %27, %7 : vector<2x128xf32>
    %38 = arith.addf %36, %37 : vector<2x128xf32>
    %39 = arith.index_cast %c0_i32_6 : i32 to index
    %c0_12 = arith.constant 0 : index
    %c0_13 = arith.constant 0 : index
    %40 = vector.load %arg7[%39, %c0_12, %c0_13] : memref<8x2x128xf32, #tpu.memory_space<vmem>>, vector<1x2x128xf32>
    %41 = vector.shape_cast %40 : vector<1x2x128xf32> to vector<2x128xf32>
    %42 = vector.shape_cast %38 : vector<2x128xf32> to vector<1x2x128xf32>
    tpu.vector_store %arg7[%39, %c0_12, %c0_13], %42 {strides = array<i32>} : memref<8x2x128xf32, #tpu.memory_space<vmem>>, vector<1x2x128xf32>,
    %43 = arith.index_cast %c0_i32_6 : i32 to index
    %c0_14 = arith.constant 0 : index
    %c0_15 = arith.constant 0 : index
    %44 = vector.load %arg3[%43, %c0_14, %c0_15] : memref<8x2x1xf32, #tpu.memory_space<vmem>>, vector<1x2x1xf32>
    %45 = vector.shape_cast %44 : vector<1x2x1xf32> to vector<2x1xf32>
    %46 = arith.subf %38, %7 : vector<2x128xf32>
    %47 = vector.broadcast %45 : vector<2x1xf32> to vector<2x128xf32>
    %48 = arith.mulf %47, %46 : vector<2x128xf32>
    %49 = arith.addf %7, %48 : vector<2x128xf32>
    %c1_i32 = arith.constant 1 : i32
    %50 = arith.index_cast %c1_i32 : i32 to index
    %c0_16 = arith.constant 0 : index
    %c0_17 = arith.constant 0 : index
    %51 = vector.load %arg2[%50, %c0_16, %c0_17] : memref<8x2x384xf32, #tpu.memory_space<vmem>>, vector<1x2x384xf32>
    %52 = vector.shape_cast %51 : vector<1x2x384xf32> to vector<2x384xf32>
    %cst_18 = arith.constant dense<0.000000e+00> : vector<2x384xf32>
    %53 = tpu.matmul %49, %3, %cst_18 {dimension_numbers = #tpu.dot_dimension_numbers<[1], [0], [0], [1], [0, 0, 1, 1], [], []>} : vector<2x128xf32>, vector<128x384xf32>, vector<2x384xf32> -> vector<2x384xf32>
    %54 = vector.extract_strided_slice %52 {offsets = [0, 0], sizes = [2, 128], strides = [1, 1]} : vector<2x384xf32> to vector<2x128xf32>
    %55 = vector.extract_strided_slice %53 {offsets = [0, 0], sizes = [2, 128], strides = [1, 1]} : vector<2x384xf32> to vector<2x128xf32>
    %56 = arith.addf %54, %55 : vector<2x128xf32>
    %57 = arith.negf %56 : vector<2x128xf32>
    %58 = math.exp %57 : vector<2x128xf32>
    %cst_19 = arith.constant 1.000000e+00 : f32
    %59 = vector.broadcast %cst_19 : f32 to vector<2x128xf32>
    %60 = arith.addf %59, %58 : vector<2x128xf32>
    %61 = arith.divf %59, %60 : vector<2x128xf32>
    %62 = vector.extract_strided_slice %52 {offsets = [0, 128], sizes = [2, 128], strides = [1, 1]} : vector<2x384xf32> to vector<2x128xf32>
    %63 = vector.extract_strided_slice %53 {offsets = [0, 128], sizes = [2, 128], strides = [1, 1]} : vector<2x384xf32> to vector<2x128xf32>
    %64 = arith.addf %62, %63 : vector<2x128xf32>
    %65 = arith.negf %64 : vector<2x128xf32>
    %66 = math.exp %65 : vector<2x128xf32>
    %cst_20 = arith.constant 1.000000e+00 : f32
    %67 = vector.broadcast %cst_20 : f32 to vector<2x128xf32>
    %68 = arith.addf %67, %66 : vector<2x128xf32>
    %69 = arith.divf %67, %68 : vector<2x128xf32>
    %70 = vector.extract_strided_slice %52 {offsets = [0, 256], sizes = [2, 128], strides = [1, 1]} : vector<2x384xf32> to vector<2x128xf32>
    %71 = vector.extract_strided_slice %53 {offsets = [0, 256], sizes = [2, 128], strides = [1, 1]} : vector<2x384xf32> to vector<2x128xf32>
    %72 = arith.addf %71, %6 : vector<2x128xf32>
    %73 = arith.mulf %61, %72 : vector<2x128xf32>
    %74 = arith.addf %70, %73 : vector<2x128xf32>
    %75 = math.tanh %74 : vector<2x128xf32>
    %cst_21 = arith.constant 1.000000e+00 : f32
    %76 = vector.broadcast %cst_21 : f32 to vector<2x128xf32>
    %77 = arith.subf %76, %69 : vector<2x128xf32>
    %78 = arith.mulf %77, %75 : vector<2x128xf32>
    %79 = arith.mulf %69, %49 : vector<2x128xf32>
    %80 = arith.addf %78, %79 : vector<2x128xf32>
    %81 = arith.index_cast %c1_i32 : i32 to index
    %c0_22 = arith.constant 0 : index
    %c0_23 = arith.constant 0 : index
    %82 = vector.load %arg7[%81, %c0_22, %c0_23] : memref<8x2x128xf32, #tpu.memory_space<vmem>>, vector<1x2x128xf32>
    %83 = vector.shape_cast %82 : vector<1x2x128xf32> to vector<2x128xf32>
    %84 = vector.shape_cast %80 : vector<2x128xf32> to vector<1x2x128xf32>
    tpu.vector_store %arg7[%81, %c0_22, %c0_23], %84 {strides = array<i32>} : memref<8x2x128xf32, #tpu.memory_space<vmem>>, vector<1x2x128xf32>,
    %85 = arith.index_cast %c1_i32 : i32 to index
    %c0_24 = arith.constant 0 : index
    %c0_25 = arith.constant 0 : index
    %86 = vector.load %arg3[%85, %c0_24, %c0_25] : memref<8x2x1xf32, #tpu.memory_space<vmem>>, vector<1x2x1xf32>
    %87 = vector.shape_cast %86 : vector<1x2x1xf32> to vector<2x1xf32>
    %88 = arith.subf %80, %49 : vector<2x128xf32>
    %89 = vector.broadcast %87 : vector<2x1xf32> to vector<2x128xf32>
    %90 = arith.mulf %89, %88 : vector<2x128xf32>
    %91 = arith.addf %49, %90 : vector<2x128xf32>
    %c2_i32 = arith.constant 2 : i32
    %92 = arith.index_cast %c2_i32 : i32 to index
    %c0_26 = arith.constant 0 : index
    %c0_27 = arith.constant 0 : index
    %93 = vector.load %arg2[%92, %c0_26, %c0_27] : memref<8x2x384xf32, #tpu.memory_space<vmem>>, vector<1x2x384xf32>
    %94 = vector.shape_cast %93 : vector<1x2x384xf32> to vector<2x384xf32>
    %cst_28 = arith.constant dense<0.000000e+00> : vector<2x384xf32>
    %95 = tpu.matmul %91, %3, %cst_28 {dimension_numbers = #tpu.dot_dimension_numbers<[1], [0], [0], [1], [0, 0, 1, 1], [], []>} : vector<2x128xf32>, vector<128x384xf32>, vector<2x384xf32> -> vector<2x384xf32>
    %96 = vector.extract_strided_slice %94 {offsets = [0, 0], sizes = [2, 128], strides = [1, 1]} : vector<2x384xf32> to vector<2x128xf32>
    %97 = vector.extract_strided_slice %95 {offsets = [0, 0], sizes = [2, 128], strides = [1, 1]} : vector<2x384xf32> to vector<2x128xf32>
    %98 = arith.addf %96, %97 : vector<2x128xf32>
    %99 = arith.negf %98 : vector<2x128xf32>
    %100 = math.exp %99 : vector<2x128xf32>
    %cst_29 = arith.constant 1.000000e+00 : f32
    %101 = vector.broadcast %cst_29 : f32 to vector<2x128xf32>
    %102 = arith.addf %101, %100 : vector<2x128xf32>
    %103 = arith.divf %101, %102 : vector<2x128xf32>
    %104 = vector.extract_strided_slice %94 {offsets = [0, 128], sizes = [2, 128], strides = [1, 1]} : vector<2x384xf32> to vector<2x128xf32>
    %105 = vector.extract_strided_slice %95 {offsets = [0, 128], sizes = [2, 128], strides = [1, 1]} : vector<2x384xf32> to vector<2x128xf32>
    %106 = arith.addf %104, %105 : vector<2x128xf32>
    %107 = arith.negf %106 : vector<2x128xf32>
    %108 = math.exp %107 : vector<2x128xf32>
    %cst_30 = arith.constant 1.000000e+00 : f32
    %109 = vector.broadcast %cst_30 : f32 to vector<2x128xf32>
    %110 = arith.addf %109, %108 : vector<2x128xf32>
    %111 = arith.divf %109, %110 : vector<2x128xf32>
    %112 = vector.extract_strided_slice %94 {offsets = [0, 256], sizes = [2, 128], strides = [1, 1]} : vector<2x384xf32> to vector<2x128xf32>
    %113 = vector.extract_strided_slice %95 {offsets = [0, 256], sizes = [2, 128], strides = [1, 1]} : vector<2x384xf32> to vector<2x128xf32>
    %114 = arith.addf %113, %6 : vector<2x128xf32>
    %115 = arith.mulf %103, %114 : vector<2x128xf32>
    %116 = arith.addf %112, %115 : vector<2x128xf32>
    %117 = math.tanh %116 : vector<2x128xf32>
    %cst_31 = arith.constant 1.000000e+00 : f32
    %118 = vector.broadcast %cst_31 : f32 to vector<2x128xf32>
    %119 = arith.subf %118, %111 : vector<2x128xf32>
    %120 = arith.mulf %119, %117 : vector<2x128xf32>
    %121 = arith.mulf %111, %91 : vector<2x128xf32>
    %122 = arith.addf %120, %121 : vector<2x128xf32>
    %123 = arith.index_cast %c2_i32 : i32 to index
    %c0_32 = arith.constant 0 : index
    %c0_33 = arith.constant 0 : index
    %124 = vector.load %arg7[%123, %c0_32, %c0_33] : memref<8x2x128xf32, #tpu.memory_space<vmem>>, vector<1x2x128xf32>
    %125 = vector.shape_cast %124 : vector<1x2x128xf32> to vector<2x128xf32>
    %126 = vector.shape_cast %122 : vector<2x128xf32> to vector<1x2x128xf32>
    tpu.vector_store %arg7[%123, %c0_32, %c0_33], %126 {strides = array<i32>} : memref<8x2x128xf32, #tpu.memory_space<vmem>>, vector<1x2x128xf32>,
    %127 = arith.index_cast %c2_i32 : i32 to index
    %c0_34 = arith.constant 0 : index
    %c0_35 = arith.constant 0 : index
    %128 = vector.load %arg3[%127, %c0_34, %c0_35] : memref<8x2x1xf32, #tpu.memory_space<vmem>>, vector<1x2x1xf32>
    %129 = vector.shape_cast %128 : vector<1x2x1xf32> to vector<2x1xf32>
    %130 = arith.subf %122, %91 : vector<2x128xf32>
    %131 = vector.broadcast %129 : vector<2x1xf32> to vector<2x128xf32>
    %132 = arith.mulf %131, %130 : vector<2x128xf32>
    %133 = arith.addf %91, %132 : vector<2x128xf32>
    %c3_i32 = arith.constant 3 : i32
    %134 = arith.index_cast %c3_i32 : i32 to index
    %c0_36 = arith.constant 0 : index
    %c0_37 = arith.constant 0 : index
    %135 = vector.load %arg2[%134, %c0_36, %c0_37] : memref<8x2x384xf32, #tpu.memory_space<vmem>>, vector<1x2x384xf32>
    %136 = vector.shape_cast %135 : vector<1x2x384xf32> to vector<2x384xf32>
    %cst_38 = arith.constant dense<0.000000e+00> : vector<2x384xf32>
    %137 = tpu.matmul %133, %3, %cst_38 {dimension_numbers = #tpu.dot_dimension_numbers<[1], [0], [0], [1], [0, 0, 1, 1], [], []>} : vector<2x128xf32>, vector<128x384xf32>, vector<2x384xf32> -> vector<2x384xf32>
    %138 = vector.extract_strided_slice %136 {offsets = [0, 0], sizes = [2, 128], strides = [1, 1]} : vector<2x384xf32> to vector<2x128xf32>
    %139 = vector.extract_strided_slice %137 {offsets = [0, 0], sizes = [2, 128], strides = [1, 1]} : vector<2x384xf32> to vector<2x128xf32>
    %140 = arith.addf %138, %139 : vector<2x128xf32>
    %141 = arith.negf %140 : vector<2x128xf32>
    %142 = math.exp %141 : vector<2x128xf32>
    %cst_39 = arith.constant 1.000000e+00 : f32
    %143 = vector.broadcast %cst_39 : f32 to vector<2x128xf32>
    %144 = arith.addf %143, %142 : vector<2x128xf32>
    %145 = arith.divf %143, %144 : vector<2x128xf32>
    %146 = vector.extract_strided_slice %136 {offsets = [0, 128], sizes = [2, 128], strides = [1, 1]} : vector<2x384xf32> to vector<2x128xf32>
    %147 = vector.extract_strided_slice %137 {offsets = [0, 128], sizes = [2, 128], strides = [1, 1]} : vector<2x384xf32> to vector<2x128xf32>
    %148 = arith.addf %146, %147 : vector<2x128xf32>
    %149 = arith.negf %148 : vector<2x128xf32>
    %150 = math.exp %149 : vector<2x128xf32>
    %cst_40 = arith.constant 1.000000e+00 : f32
    %151 = vector.broadcast %cst_40 : f32 to vector<2x128xf32>
    %152 = arith.addf %151, %150 : vector<2x128xf32>
    %153 = arith.divf %151, %152 : vector<2x128xf32>
    %154 = vector.extract_strided_slice %136 {offsets = [0, 256], sizes = [2, 128], strides = [1, 1]} : vector<2x384xf32> to vector<2x128xf32>
    %155 = vector.extract_strided_slice %137 {offsets = [0, 256], sizes = [2, 128], strides = [1, 1]} : vector<2x384xf32> to vector<2x128xf32>
    %156 = arith.addf %155, %6 : vector<2x128xf32>
    %157 = arith.mulf %145, %156 : vector<2x128xf32>
    %158 = arith.addf %154, %157 : vector<2x128xf32>
    %159 = math.tanh %158 : vector<2x128xf32>
    %cst_41 = arith.constant 1.000000e+00 : f32
    %160 = vector.broadcast %cst_41 : f32 to vector<2x128xf32>
    %161 = arith.subf %160, %153 : vector<2x128xf32>
    %162 = arith.mulf %161, %159 : vector<2x128xf32>
    %163 = arith.mulf %153, %133 : vector<2x128xf32>
    %164 = arith.addf %162, %163 : vector<2x128xf32>
    %165 = arith.index_cast %c3_i32 : i32 to index
    %c0_42 = arith.constant 0 : index
    %c0_43 = arith.constant 0 : index
    %166 = vector.load %arg7[%165, %c0_42, %c0_43] : memref<8x2x128xf32, #tpu.memory_space<vmem>>, vector<1x2x128xf32>
    %167 = vector.shape_cast %166 : vector<1x2x128xf32> to vector<2x128xf32>
    %168 = vector.shape_cast %164 : vector<2x128xf32> to vector<1x2x128xf32>
    tpu.vector_store %arg7[%165, %c0_42, %c0_43], %168 {strides = array<i32>} : memref<8x2x128xf32, #tpu.memory_space<vmem>>, vector<1x2x128xf32>,
    %169 = arith.index_cast %c3_i32 : i32 to index
    %c0_44 = arith.constant 0 : index
    %c0_45 = arith.constant 0 : index
    %170 = vector.load %arg3[%169, %c0_44, %c0_45] : memref<8x2x1xf32, #tpu.memory_space<vmem>>, vector<1x2x1xf32>
    %171 = vector.shape_cast %170 : vector<1x2x1xf32> to vector<2x1xf32>
    %172 = arith.subf %164, %133 : vector<2x128xf32>
    %173 = vector.broadcast %171 : vector<2x1xf32> to vector<2x128xf32>
    %174 = arith.mulf %173, %172 : vector<2x128xf32>
    %175 = arith.addf %133, %174 : vector<2x128xf32>
    %c4_i32 = arith.constant 4 : i32
    %176 = arith.index_cast %c4_i32 : i32 to index
    %c0_46 = arith.constant 0 : index
    %c0_47 = arith.constant 0 : index
    %177 = vector.load %arg2[%176, %c0_46, %c0_47] : memref<8x2x384xf32, #tpu.memory_space<vmem>>, vector<1x2x384xf32>
    %178 = vector.shape_cast %177 : vector<1x2x384xf32> to vector<2x384xf32>
    %cst_48 = arith.constant dense<0.000000e+00> : vector<2x384xf32>
    %179 = tpu.matmul %175, %3, %cst_48 {dimension_numbers = #tpu.dot_dimension_numbers<[1], [0], [0], [1], [0, 0, 1, 1], [], []>} : vector<2x128xf32>, vector<128x384xf32>, vector<2x384xf32> -> vector<2x384xf32>
    %180 = vector.extract_strided_slice %178 {offsets = [0, 0], sizes = [2, 128], strides = [1, 1]} : vector<2x384xf32> to vector<2x128xf32>
    %181 = vector.extract_strided_slice %179 {offsets = [0, 0], sizes = [2, 128], strides = [1, 1]} : vector<2x384xf32> to vector<2x128xf32>
    %182 = arith.addf %180, %181 : vector<2x128xf32>
    %183 = arith.negf %182 : vector<2x128xf32>
    %184 = math.exp %183 : vector<2x128xf32>
    %cst_49 = arith.constant 1.000000e+00 : f32
    %185 = vector.broadcast %cst_49 : f32 to vector<2x128xf32>
    %186 = arith.addf %185, %184 : vector<2x128xf32>
    %187 = arith.divf %185, %186 : vector<2x128xf32>
    %188 = vector.extract_strided_slice %178 {offsets = [0, 128], sizes = [2, 128], strides = [1, 1]} : vector<2x384xf32> to vector<2x128xf32>
    %189 = vector.extract_strided_slice %179 {offsets = [0, 128], sizes = [2, 128], strides = [1, 1]} : vector<2x384xf32> to vector<2x128xf32>
    %190 = arith.addf %188, %189 : vector<2x128xf32>
    %191 = arith.negf %190 : vector<2x128xf32>
    %192 = math.exp %191 : vector<2x128xf32>
    %cst_50 = arith.constant 1.000000e+00 : f32
    %193 = vector.broadcast %cst_50 : f32 to vector<2x128xf32>
    %194 = arith.addf %193, %192 : vector<2x128xf32>
    %195 = arith.divf %193, %194 : vector<2x128xf32>
    %196 = vector.extract_strided_slice %178 {offsets = [0, 256], sizes = [2, 128], strides = [1, 1]} : vector<2x384xf32> to vector<2x128xf32>
    %197 = vector.extract_strided_slice %179 {offsets = [0, 256], sizes = [2, 128], strides = [1, 1]} : vector<2x384xf32> to vector<2x128xf32>
    %198 = arith.addf %197, %6 : vector<2x128xf32>
    %199 = arith.mulf %187, %198 : vector<2x128xf32>
    %200 = arith.addf %196, %199 : vector<2x128xf32>
    %201 = math.tanh %200 : vector<2x128xf32>
    %cst_51 = arith.constant 1.000000e+00 : f32
    %202 = vector.broadcast %cst_51 : f32 to vector<2x128xf32>
    %203 = arith.subf %202, %195 : vector<2x128xf32>
    %204 = arith.mulf %203, %201 : vector<2x128xf32>
    %205 = arith.mulf %195, %175 : vector<2x128xf32>
    %206 = arith.addf %204, %205 : vector<2x128xf32>
    %207 = arith.index_cast %c4_i32 : i32 to index
    %c0_52 = arith.constant 0 : index
    %c0_53 = arith.constant 0 : index
    %208 = vector.load %arg7[%207, %c0_52, %c0_53] : memref<8x2x128xf32, #tpu.memory_space<vmem>>, vector<1x2x128xf32>
    %209 = vector.shape_cast %208 : vector<1x2x128xf32> to vector<2x128xf32>
    %210 = vector.shape_cast %206 : vector<2x128xf32> to vector<1x2x128xf32>
    tpu.vector_store %arg7[%207, %c0_52, %c0_53], %210 {strides = array<i32>} : memref<8x2x128xf32, #tpu.memory_space<vmem>>, vector<1x2x128xf32>,
    %211 = arith.index_cast %c4_i32 : i32 to index
    %c0_54 = arith.constant 0 : index
    %c0_55 = arith.constant 0 : index
    %212 = vector.load %arg3[%211, %c0_54, %c0_55] : memref<8x2x1xf32, #tpu.memory_space<vmem>>, vector<1x2x1xf32>
    %213 = vector.shape_cast %212 : vector<1x2x1xf32> to vector<2x1xf32>
    %214 = arith.subf %206, %175 : vector<2x128xf32>
    %215 = vector.broadcast %213 : vector<2x1xf32> to vector<2x128xf32>
    %216 = arith.mulf %215, %214 : vector<2x128xf32>
    %217 = arith.addf %175, %216 : vector<2x128xf32>
    %c5_i32 = arith.constant 5 : i32
    %218 = arith.index_cast %c5_i32 : i32 to index
    %c0_56 = arith.constant 0 : index
    %c0_57 = arith.constant 0 : index
    %219 = vector.load %arg2[%218, %c0_56, %c0_57] : memref<8x2x384xf32, #tpu.memory_space<vmem>>, vector<1x2x384xf32>
    %220 = vector.shape_cast %219 : vector<1x2x384xf32> to vector<2x384xf32>
    %cst_58 = arith.constant dense<0.000000e+00> : vector<2x384xf32>
    %221 = tpu.matmul %217, %3, %cst_58 {dimension_numbers = #tpu.dot_dimension_numbers<[1], [0], [0], [1], [0, 0, 1, 1], [], []>} : vector<2x128xf32>, vector<128x384xf32>, vector<2x384xf32> -> vector<2x384xf32>
    %222 = vector.extract_strided_slice %220 {offsets = [0, 0], sizes = [2, 128], strides = [1, 1]} : vector<2x384xf32> to vector<2x128xf32>
    %223 = vector.extract_strided_slice %221 {offsets = [0, 0], sizes = [2, 128], strides = [1, 1]} : vector<2x384xf32> to vector<2x128xf32>
    %224 = arith.addf %222, %223 : vector<2x128xf32>
    %225 = arith.negf %224 : vector<2x128xf32>
    %226 = math.exp %225 : vector<2x128xf32>
    %cst_59 = arith.constant 1.000000e+00 : f32
    %227 = vector.broadcast %cst_59 : f32 to vector<2x128xf32>
    %228 = arith.addf %227, %226 : vector<2x128xf32>
    %229 = arith.divf %227, %228 : vector<2x128xf32>
    %230 = vector.extract_strided_slice %220 {offsets = [0, 128], sizes = [2, 128], strides = [1, 1]} : vector<2x384xf32> to vector<2x128xf32>
    %231 = vector.extract_strided_slice %221 {offsets = [0, 128], sizes = [2, 128], strides = [1, 1]} : vector<2x384xf32> to vector<2x128xf32>
    %232 = arith.addf %230, %231 : vector<2x128xf32>
    %233 = arith.negf %232 : vector<2x128xf32>
    %234 = math.exp %233 : vector<2x128xf32>
    %cst_60 = arith.constant 1.000000e+00 : f32
    %235 = vector.broadcast %cst_60 : f32 to vector<2x128xf32>
    %236 = arith.addf %235, %234 : vector<2x128xf32>
    %237 = arith.divf %235, %236 : vector<2x128xf32>
    %238 = vector.extract_strided_slice %220 {offsets = [0, 256], sizes = [2, 128], strides = [1, 1]} : vector<2x384xf32> to vector<2x128xf32>
    %239 = vector.extract_strided_slice %221 {offsets = [0, 256], sizes = [2, 128], strides = [1, 1]} : vector<2x384xf32> to vector<2x128xf32>
    %240 = arith.addf %239, %6 : vector<2x128xf32>
    %241 = arith.mulf %229, %240 : vector<2x128xf32>
    %242 = arith.addf %238, %241 : vector<2x128xf32>
    %243 = math.tanh %242 : vector<2x128xf32>
    %cst_61 = arith.constant 1.000000e+00 : f32
    %244 = vector.broadcast %cst_61 : f32 to vector<2x128xf32>
    %245 = arith.subf %244, %237 : vector<2x128xf32>
    %246 = arith.mulf %245, %243 : vector<2x128xf32>
    %247 = arith.mulf %237, %217 : vector<2x128xf32>
    %248 = arith.addf %246, %247 : vector<2x128xf32>
    %249 = arith.index_cast %c5_i32 : i32 to index
    %c0_62 = arith.constant 0 : index
    %c0_63 = arith.constant 0 : index
    %250 = vector.load %arg7[%249, %c0_62, %c0_63] : memref<8x2x128xf32, #tpu.memory_space<vmem>>, vector<1x2x128xf32>
    %251 = vector.shape_cast %250 : vector<1x2x128xf32> to vector<2x128xf32>
    %252 = vector.shape_cast %248 : vector<2x128xf32> to vector<1x2x128xf32>
    tpu.vector_store %arg7[%249, %c0_62, %c0_63], %252 {strides = array<i32>} : memref<8x2x128xf32, #tpu.memory_space<vmem>>, vector<1x2x128xf32>,
    %253 = arith.index_cast %c5_i32 : i32 to index
    %c0_64 = arith.constant 0 : index
    %c0_65 = arith.constant 0 : index
    %254 = vector.load %arg3[%253, %c0_64, %c0_65] : memref<8x2x1xf32, #tpu.memory_space<vmem>>, vector<1x2x1xf32>
    %255 = vector.shape_cast %254 : vector<1x2x1xf32> to vector<2x1xf32>
    %256 = arith.subf %248, %217 : vector<2x128xf32>
    %257 = vector.broadcast %255 : vector<2x1xf32> to vector<2x128xf32>
    %258 = arith.mulf %257, %256 : vector<2x128xf32>
    %259 = arith.addf %217, %258 : vector<2x128xf32>
    %c6_i32 = arith.constant 6 : i32
    %260 = arith.index_cast %c6_i32 : i32 to index
    %c0_66 = arith.constant 0 : index
    %c0_67 = arith.constant 0 : index
    %261 = vector.load %arg2[%260, %c0_66, %c0_67] : memref<8x2x384xf32, #tpu.memory_space<vmem>>, vector<1x2x384xf32>
    %262 = vector.shape_cast %261 : vector<1x2x384xf32> to vector<2x384xf32>
    %cst_68 = arith.constant dense<0.000000e+00> : vector<2x384xf32>
    %263 = tpu.matmul %259, %3, %cst_68 {dimension_numbers = #tpu.dot_dimension_numbers<[1], [0], [0], [1], [0, 0, 1, 1], [], []>} : vector<2x128xf32>, vector<128x384xf32>, vector<2x384xf32> -> vector<2x384xf32>
    %264 = vector.extract_strided_slice %262 {offsets = [0, 0], sizes = [2, 128], strides = [1, 1]} : vector<2x384xf32> to vector<2x128xf32>
    %265 = vector.extract_strided_slice %263 {offsets = [0, 0], sizes = [2, 128], strides = [1, 1]} : vector<2x384xf32> to vector<2x128xf32>
    %266 = arith.addf %264, %265 : vector<2x128xf32>
    %267 = arith.negf %266 : vector<2x128xf32>
    %268 = math.exp %267 : vector<2x128xf32>
    %cst_69 = arith.constant 1.000000e+00 : f32
    %269 = vector.broadcast %cst_69 : f32 to vector<2x128xf32>
    %270 = arith.addf %269, %268 : vector<2x128xf32>
    %271 = arith.divf %269, %270 : vector<2x128xf32>
    %272 = vector.extract_strided_slice %262 {offsets = [0, 128], sizes = [2, 128], strides = [1, 1]} : vector<2x384xf32> to vector<2x128xf32>
    %273 = vector.extract_strided_slice %263 {offsets = [0, 128], sizes = [2, 128], strides = [1, 1]} : vector<2x384xf32> to vector<2x128xf32>
    %274 = arith.addf %272, %273 : vector<2x128xf32>
    %275 = arith.negf %274 : vector<2x128xf32>
    %276 = math.exp %275 : vector<2x128xf32>
    %cst_70 = arith.constant 1.000000e+00 : f32
    %277 = vector.broadcast %cst_70 : f32 to vector<2x128xf32>
    %278 = arith.addf %277, %276 : vector<2x128xf32>
    %279 = arith.divf %277, %278 : vector<2x128xf32>
    %280 = vector.extract_strided_slice %262 {offsets = [0, 256], sizes = [2, 128], strides = [1, 1]} : vector<2x384xf32> to vector<2x128xf32>
    %281 = vector.extract_strided_slice %263 {offsets = [0, 256], sizes = [2, 128], strides = [1, 1]} : vector<2x384xf32> to vector<2x128xf32>
    %282 = arith.addf %281, %6 : vector<2x128xf32>
    %283 = arith.mulf %271, %282 : vector<2x128xf32>
    %284 = arith.addf %280, %283 : vector<2x128xf32>
    %285 = math.tanh %284 : vector<2x128xf32>
    %cst_71 = arith.constant 1.000000e+00 : f32
    %286 = vector.broadcast %cst_71 : f32 to vector<2x128xf32>
    %287 = arith.subf %286, %279 : vector<2x128xf32>
    %288 = arith.mulf %287, %285 : vector<2x128xf32>
    %289 = arith.mulf %279, %259 : vector<2x128xf32>
    %290 = arith.addf %288, %289 : vector<2x128xf32>
    %291 = arith.index_cast %c6_i32 : i32 to index
    %c0_72 = arith.constant 0 : index
    %c0_73 = arith.constant 0 : index
    %292 = vector.load %arg7[%291, %c0_72, %c0_73] : memref<8x2x128xf32, #tpu.memory_space<vmem>>, vector<1x2x128xf32>
    %293 = vector.shape_cast %292 : vector<1x2x128xf32> to vector<2x128xf32>
    %294 = vector.shape_cast %290 : vector<2x128xf32> to vector<1x2x128xf32>
    tpu.vector_store %arg7[%291, %c0_72, %c0_73], %294 {strides = array<i32>} : memref<8x2x128xf32, #tpu.memory_space<vmem>>, vector<1x2x128xf32>,
    %295 = arith.index_cast %c6_i32 : i32 to index
    %c0_74 = arith.constant 0 : index
    %c0_75 = arith.constant 0 : index
    %296 = vector.load %arg3[%295, %c0_74, %c0_75] : memref<8x2x1xf32, #tpu.memory_space<vmem>>, vector<1x2x1xf32>
    %297 = vector.shape_cast %296 : vector<1x2x1xf32> to vector<2x1xf32>
    %298 = arith.subf %290, %259 : vector<2x128xf32>
    %299 = vector.broadcast %297 : vector<2x1xf32> to vector<2x128xf32>
    %300 = arith.mulf %299, %298 : vector<2x128xf32>
    %301 = arith.addf %259, %300 : vector<2x128xf32>
    %c7_i32 = arith.constant 7 : i32
    %302 = arith.index_cast %c7_i32 : i32 to index
    %c0_76 = arith.constant 0 : index
    %c0_77 = arith.constant 0 : index
    %303 = vector.load %arg2[%302, %c0_76, %c0_77] : memref<8x2x384xf32, #tpu.memory_space<vmem>>, vector<1x2x384xf32>
    %304 = vector.shape_cast %303 : vector<1x2x384xf32> to vector<2x384xf32>
    %cst_78 = arith.constant dense<0.000000e+00> : vector<2x384xf32>
    %305 = tpu.matmul %301, %3, %cst_78 {dimension_numbers = #tpu.dot_dimension_numbers<[1], [0], [0], [1], [0, 0, 1, 1], [], []>} : vector<2x128xf32>, vector<128x384xf32>, vector<2x384xf32> -> vector<2x384xf32>
    %306 = vector.extract_strided_slice %304 {offsets = [0, 0], sizes = [2, 128], strides = [1, 1]} : vector<2x384xf32> to vector<2x128xf32>
    %307 = vector.extract_strided_slice %305 {offsets = [0, 0], sizes = [2, 128], strides = [1, 1]} : vector<2x384xf32> to vector<2x128xf32>
    %308 = arith.addf %306, %307 : vector<2x128xf32>
    %309 = arith.negf %308 : vector<2x128xf32>
    %310 = math.exp %309 : vector<2x128xf32>
    %cst_79 = arith.constant 1.000000e+00 : f32
    %311 = vector.broadcast %cst_79 : f32 to vector<2x128xf32>
    %312 = arith.addf %311, %310 : vector<2x128xf32>
    %313 = arith.divf %311, %312 : vector<2x128xf32>
    %314 = vector.extract_strided_slice %304 {offsets = [0, 128], sizes = [2, 128], strides = [1, 1]} : vector<2x384xf32> to vector<2x128xf32>
    %315 = vector.extract_strided_slice %305 {offsets = [0, 128], sizes = [2, 128], strides = [1, 1]} : vector<2x384xf32> to vector<2x128xf32>
    %316 = arith.addf %314, %315 : vector<2x128xf32>
    %317 = arith.negf %316 : vector<2x128xf32>
    %318 = math.exp %317 : vector<2x128xf32>
    %cst_80 = arith.constant 1.000000e+00 : f32
    %319 = vector.broadcast %cst_80 : f32 to vector<2x128xf32>
    %320 = arith.addf %319, %318 : vector<2x128xf32>
    %321 = arith.divf %319, %320 : vector<2x128xf32>
    %322 = vector.extract_strided_slice %304 {offsets = [0, 256], sizes = [2, 128], strides = [1, 1]} : vector<2x384xf32> to vector<2x128xf32>
    %323 = vector.extract_strided_slice %305 {offsets = [0, 256], sizes = [2, 128], strides = [1, 1]} : vector<2x384xf32> to vector<2x128xf32>
    %324 = arith.addf %323, %6 : vector<2x128xf32>
    %325 = arith.mulf %313, %324 : vector<2x128xf32>
    %326 = arith.addf %322, %325 : vector<2x128xf32>
    %327 = math.tanh %326 : vector<2x128xf32>
    %cst_81 = arith.constant 1.000000e+00 : f32
    %328 = vector.broadcast %cst_81 : f32 to vector<2x128xf32>
    %329 = arith.subf %328, %321 : vector<2x128xf32>
    %330 = arith.mulf %329, %327 : vector<2x128xf32>
    %331 = arith.mulf %321, %301 : vector<2x128xf32>
    %332 = arith.addf %330, %331 : vector<2x128xf32>
    %333 = arith.index_cast %c7_i32 : i32 to index
    %c0_82 = arith.constant 0 : index
    %c0_83 = arith.constant 0 : index
    %334 = vector.load %arg7[%333, %c0_82, %c0_83] : memref<8x2x128xf32, #tpu.memory_space<vmem>>, vector<1x2x128xf32>
    %335 = vector.shape_cast %334 : vector<1x2x128xf32> to vector<2x128xf32>
    %336 = vector.shape_cast %332 : vector<2x128xf32> to vector<1x2x128xf32>
    tpu.vector_store %arg7[%333, %c0_82, %c0_83], %336 {strides = array<i32>} : memref<8x2x128xf32, #tpu.memory_space<vmem>>, vector<1x2x128xf32>,
    %337 = arith.index_cast %c7_i32 : i32 to index
    %c0_84 = arith.constant 0 : index
    %c0_85 = arith.constant 0 : index
    %338 = vector.load %arg3[%337, %c0_84, %c0_85] : memref<8x2x1xf32, #tpu.memory_space<vmem>>, vector<1x2x1xf32>
    %339 = vector.shape_cast %338 : vector<1x2x1xf32> to vector<2x1xf32>
    %340 = arith.subf %332, %301 : vector<2x128xf32>
    %341 = vector.broadcast %339 : vector<2x1xf32> to vector<2x128xf32>
    %342 = arith.mulf %341, %340 : vector<2x128xf32>
    %343 = arith.addf %301, %342 : vector<2x128xf32>
    %c8_i32 = arith.constant 8 : i32
    %c0_86 = arith.constant 0 : index
    %c0_87 = arith.constant 0 : index
    %344 = vector.load %arg9[%c0_86, %c0_87] : memref<2x128xf32, #tpu.memory_space<vmem>>, vector<2x128xf32>
    tpu.vector_store %arg9[%c0_86, %c0_87], %343 {strides = array<i32>} : memref<2x128xf32, #tpu.memory_space<vmem>>, vector<2x128xf32>,
    %c0_i32_88 = arith.constant 0 : i32
    %345 = arith.cmpi eq, %arg1, %c0_i32_88 : i32
    %346 = arith.extui %345 : i1 to i32
    %c0_i32_89 = arith.constant 0 : i32
    %347 = arith.cmpi ne, %346, %c0_i32_89 : i32
    scf.if %347 {
      %c0_90 = arith.constant 0 : index
      %c0_91 = arith.constant 0 : index
      %348 = vector.load %arg9[%c0_90, %c0_91] : memref<2x128xf32, #tpu.memory_space<vmem>>, vector<2x128xf32>
      %c0_92 = arith.constant 0 : index
      %c0_93 = arith.constant 0 : index
      %349 = vector.load %arg8[%c0_92, %c0_93] : memref<2x128xf32, #tpu.memory_space<vmem>>, vector<2x128xf32>
      tpu.vector_store %arg8[%c0_92, %c0_93], %348 {strides = array<i32>} : memref<2x128xf32, #tpu.memory_space<vmem>>, vector<2x128xf32>,
    } else {
    }
    return
  }
  func.func @transform_0(%arg0: i32, %arg1: i32) -> (i32, i32, i32) {
    %c0_i32 = arith.constant 0 : i32
    %c0_i32_0 = arith.constant 0 : i32
    return %arg1, %arg0, %c0_i32 : i32, i32, i32
  }
  func.func @transform_1(%arg0: i32, %arg1: i32) -> (i32, i32, i32) {
    %c0_i32 = arith.constant 0 : i32
    %c0_i32_0 = arith.constant 0 : i32
    return %arg1, %arg0, %c0_i32 : i32, i32, i32
  }
  func.func @transform_2(%arg0: i32, %arg1: i32) -> (i32, i32) {
    %c0_i32 = arith.constant 0 : i32
    %c0_i32_0 = arith.constant 0 : i32
    return %arg0, %c0_i32 : i32, i32
  }
  func.func @transform_3(%arg0: i32, %arg1: i32) -> (i32, i32) {
    %c0_i32 = arith.constant 0 : i32
    %c0_i32_0 = arith.constant 0 : i32
    %c0_i32_1 = arith.constant 0 : i32
    return %c0_i32, %c0_i32_0 : i32, i32
  }
  func.func @transform_4(%arg0: i32, %arg1: i32) -> (i32, i32) {
    %c0_i32 = arith.constant 0 : i32
    %c0_i32_0 = arith.constant 0 : i32
    %c0_i32_1 = arith.constant 0 : i32
    return %c0_i32, %c0_i32_0 : i32, i32
  }
  func.func @transform_5(%arg0: i32, %arg1: i32) -> (i32, i32, i32) {
    %c0_i32 = arith.constant 0 : i32
    %c0_i32_0 = arith.constant 0 : i32
    return %arg1, %arg0, %c0_i32 : i32, i32, i32
  }
  func.func @transform_6(%arg0: i32, %arg1: i32) -> (i32, i32) {
    %c0_i32 = arith.constant 0 : i32
    %c0_i32_0 = arith.constant 0 : i32
    return %arg0, %c0_i32 : i32, i32
  }
}

</mosaic_0001>

<bundles_post_ra>
// kernel: tpu_custom_call.1
= control target key start
LH: loop header
LB: loop body
LE: loop exit
PB: predicated region body
PF: predicated region fallthrough
CT: control target
= control target key end

     0   :  { %12 = vsyncpa [#allocation4], 0  ;;  %s3159_s0 = inlined_call_operand.hbm [shape: f32[8,2,384], index: 0, kind: input, shape index: {}]   ;;  %s3160_s1 = inlined_call_operand.vmem [shape: f32[8,2,1], index: 1, kind: input, shape index: {}]   ;;  %s3161_s2 = inlined_call_operand.vmem [shape: f32[2,128], index: 2, kind: input, shape index: {}]   ;;  %s3162_s3 = inlined_call_operand.hbm [shape: f32[128,384], index: 3, kind: input, shape index: {}]   ;;  %s3163_s4 = inlined_call_operand.vmem [shape: f32[1,128], index: 4, kind: input, shape index: {}]   ;;  %s3164_s5 = inlined_call_operand.hbm [shape: f32[8,2,128], index: 5, kind: output, shape index: {0}]   ;;  %s3165_s6 = inlined_call_operand.hbm [shape: f32[2,128], index: 6, kind: output, shape index: {1}]  }
   0x1   :  { %13 = vsyncpa [#allocation7], 0 }
   0x2   :  { %14 = vsyncpa [#allocation5], 0 }
   0x3   :  { %15 = vsyncpa [#allocation10], 0  ;;  %s2277_s21 = smov [#allocation3]  }
   0x4   :  { %s21_s22 = sshll.u32 %s2277_s21, 4  ;;  %s22_s22 = int_to_ptr.vmem [resolvable:$true] %s21_s22 }
   0x5   :  { %s2197_s23 = scalar_lea.vmem %s22_s22, 768  ;;  %p2202_p1 = scmp.lt.s32.totalorder %s22_s22, %s22_s22 }
   0x6   :  { %p2198_p0 = scmp.ne.s32.totalorder %s22_s22, %s2197_s23  ;;  %p2203_p2 = scmp.lt.s32.totalorder %s2197_s23, %s2197_s23 }
   0x8   :  { %p2204_p3 = por %p2203_p2, %p2202_p1 }
   0xa   :  { %p2205_p4 = pnand %p2204_p3, %p2198_p0 }
   0xc   :  { %2208 = shalt.err (!%p2205_p4)
}
   0xd   :  { %s2278_s24 = smov 96   ;;  %s2279_s25 = smov 6  }
   0xe   :  { %27 = dma.hbm_to_vmem [thread:$0]  %s3159_s0, 768, %s22_s22, [#allocation4], %s2278_s24, %s2278_s24, %s2279_s25  }
   0xf   :  { %s2280_s28 = smov [#allocation6]  }
  0x10   :  { %s37_s29 = sshll.u32 %s2280_s28, 4  ;;  %s38_s29 = int_to_ptr.vmem [resolvable:$true] %s37_s29 }
  0x11   :  { %s2217_s30 = scalar_lea.vmem %s38_s29, 6144  ;;  %p2222_p6 = scmp.lt.s32.totalorder %s38_s29, %s38_s29 }
  0x12   :  { %p2218_p5 = scmp.ne.s32.totalorder %s38_s29, %s2217_s30  ;;  %p2223_p7 = scmp.lt.s32.totalorder %s2217_s30, %s2217_s30 }
  0x14   :  { %p2224_p8 = por %p2223_p7, %p2222_p6 }
  0x16   :  { %p2225_p9 = pnand %p2224_p8, %p2218_p5 }
  0x18   :  { %2228 = shalt.err (!%p2225_p9)
}
  0x19   :  { %s2281_s7 = smov 384   ;;  %s2282_s8 = smov 24  }
  0x1a   :  { %43 = dma.hbm_to_vmem [thread:$0]  %s3162_s3, 6144, %s38_s29, [#allocation7], %s2281_s7, %s2281_s7, %s2282_s8  }
  0x1b   :  { %2269 = dma.done.wait [#allocation4], 768  }
  0x1c   :  { %2270 = vsyncadd [#allocation4], 4294966528 }
  0x1d   :  { %2271 = dma.done.wait [#allocation7], 6144  }
  0x1e   :  { %2272 = vsyncadd [#allocation7], 4294961152  ;;  %v3166_v0 = vmov 0.0   ;;  %vm2284_vm0 = vmmov 0   ;;  %v2285_v1 = vmov 0   ;;  %v2335_v2 = vld [vmem:[#allocation6 + $0x170] sm:$0xff] }
  0x1f   :  { %1765 = vmatprep.subr.mxu1 %v3166_v0  ;;  %179 = vmatprep.mubr.f32.mxu0 %v3166_v0  ;;  %3183 = vst [vmem:[#allocation15_spill] sm:$0xff] %v2335_v2  ;;  %v2337_v3 = vld [vmem:[#allocation6 + $0x168] sm:$0xff]  ;;  %v2339_v4 = vld [vmem:[#allocation6 + $0x158] sm:$0xff]  ;;  %v2342_v5 = vld [vmem:[#allocation6 + $0x150] sm:$0xff] }
  0x20   :  { %1797 = vmatprep.mubr.msk.f32.mxu1 %vm2284_vm0, %v3166_v0  ;;  %2058 = vset.pattern.permute.xlu0 %v2285_v1  ;;  %v2345_v6 = vld [vmem:[#allocation6 + $0x140] sm:$0xff]  ;;  %v2348_v7 = vld [vmem:[#allocation6 + $0x138] sm:$0xff]  ;;  %v2351_v8 = vld [vmem:[#allocation6 + $0x128] sm:$0xff] }
  0x21   :  { %2059 = vset.pattern.permute.xlu1 %v2285_v1  ;;  %115 = vmatprep.subr.mxu0 %v2335_v2  ;;  %v2354_v9 = vld [vmem:[#allocation6 + $0x120] sm:$0xff]  ;;  %v2357_v10 = vld [vmem:[#allocation6 + $0x110] sm:$0xff]  ;;  %v2360_v11 = vld [vmem:[#allocation6 + $0x108] sm:$0xff] }
  0x22   :  { %116 = vmatpush1.msra.mxu0 %v2337_v3  ;;  %v2363_v12 = vld [vmem:[#allocation6 + $0xf8] sm:$0xff]  ;;  %v2366_v13 = vld [vmem:[#allocation6 + $0xf0] sm:$0xff]  ;;  %v2369_v14 = vld [vmem:[#allocation6 + $0xe0] sm:$0xff] }
  0x23   :  { %117 = vmatprep.subr.mxu0 %v2339_v4  ;;  %v2371_v15 = vld [vmem:[#allocation6 + $0x178] sm:$0xff]  ;;  %v56_v17 = vld [vmem:[%s3161_s2] sm:$0x3]  ;;  %v2380_v18 = vld [vmem:[#allocation6 + $0x160] sm:$0xff] }
  0x24   :  { %118 = vmatpush1.msra.mxu0 %v2342_v5  ;;  %v2374_v16 = vld [vmem:[#allocation6 + $0xd8] sm:$0xff]  ;;  %1766 = vmatpush3.msra.mxu1 %v2371_v15  ;;  %v2383_v19 = vld [vmem:[#allocation6 + $0xc8] sm:$0xff]  ;;  %57 = vst [vmem:[#allocation2] sm:$0x3] %v56_v17  ;;  %v2389_v21 = vld [vmem:[#allocation6 + $0xc0] sm:$0xff] }
  0x25   :  { %119 = vmatprep.subr.mxu0 %v2345_v6  ;;  %1767 = vmatprep.subr.mxu1 %v3166_v0  ;;  %v2386_v20 = vld [vmem:[#allocation6 + $0x148] sm:$0xff]  ;;  %v2393_v22 = vld [vmem:[#allocation6 + $0xb0] sm:$0xff]  ;;  %v2403_v25 = vld [vmem:[#allocation6 + $0x98] sm:$0xff] }
  0x26   :  { %120 = vmatpush1.msra.mxu0 %v2348_v7  ;;  %1768 = vmatpush3.msra.mxu1 %v2380_v18  ;;  %v2396_v23 = vld [vmem:[#allocation6 + $0x130] sm:$0xff]  ;;  %v2399_v24 = vld [vmem:[#allocation6 + $0xa8] sm:$0xff]  ;;  %v2406_v26 = vld [vmem:[#allocation6 + $0x118] sm:$0xff] }
  0x27   :  { %121 = vmatprep.subr.mxu0 %v2351_v8  ;;  %1769 = vmatprep.subr.mxu1 %v3166_v0  ;;  %v2409_v27 = vld [vmem:[#allocation6 + $0x90] sm:$0xff]  ;;  %v2413_v28 = vld [vmem:[#allocation6 + $0x80] sm:$0xff]  ;;  %v2419_v30 = vld [vmem:[#allocation6 + $0x78] sm:$0xff] }
  0x28   :  { %122 = vmatpush1.msra.mxu0 %v2354_v9  ;;  %1770 = vmatpush3.msra.mxu1 %v2386_v20  ;;  %v2416_v29 = vld [vmem:[#allocation6 + $0x100] sm:$0xff]  ;;  %v2423_v31 = vld [vmem:[#allocation6 + $0x68] sm:$0xff]  ;;  %v2433_v34 = vld [vmem:[#allocation6 + $0x50] sm:$0xff] }
  0x29   :  { %123 = vmatprep.subr.mxu0 %v2357_v10  ;;  %1771 = vmatprep.subr.mxu1 %v3166_v0  ;;  %v2426_v32 = vld [vmem:[#allocation6 + $0xe8] sm:$0xff]  ;;  %v2429_v33 = vld [vmem:[#allocation6 + $0x60] sm:$0xff]  ;;  %v2436_v35 = vld [vmem:[#allocation6 + $0xd0] sm:$0xff] }
  0x2a   :  { %124 = vmatpush1.msra.mxu0 %v2360_v11  ;;  %1772 = vmatpush3.msra.mxu1 %v2396_v23  ;;  %v2439_v36 = vld [vmem:[#allocation6 + $0x48] sm:$0xff]  ;;  %v2443_v37 = vld [vmem:[#allocation6 + $0x38] sm:$0xff]  ;;  %v2449_v39 = vld [vmem:[#allocation6 + $0x30] sm:$0xff] }
  0x2b   :  { %125 = vmatprep.subr.mxu0 %v2363_v12  ;;  %1773 = vmatprep.subr.mxu1 %v3166_v0  ;;  %v2446_v38 = vld [vmem:[#allocation6 + $0xb8] sm:$0xff]  ;;  %v2453_v40 = vld [vmem:[#allocation6 + $0x20] sm:$0xff]  ;;  %v2463_v43 = vld [vmem:[#allocation6 + $0x8] sm:$0xff] }
  0x2c   :  { %126 = vmatpush1.msra.mxu0 %v2366_v13  ;;  %1774 = vmatpush3.msra.mxu1 %v2406_v26  ;;  %v2456_v41 = vld [vmem:[#allocation6 + $0xa0] sm:$0xff]  ;;  %v2459_v42 = vld [vmem:[#allocation6 + $0x18] sm:$0xff]  ;;  %3185 = vst [vmem:[#allocation17_spill] sm:$0xff] %v2463_v43  ;;  %v2466_v44 = vld [vmem:[#allocation6 + $0x88] sm:$0xff] }
  0x2d   :  { %127 = vmatprep.subr.mxu0 %v2369_v14  ;;  %1775 = vmatprep.subr.mxu1 %v3166_v0  ;;  %3184 = vst [vmem:[#allocation16_spill] sm:$0xff] %v2459_v42  ;;  %v2469_v45 = vld [vmem:[#allocation6] sm:$0xff]  ;;  %v2473_v46 = vld [vmem:[#allocation2] sm:$0x3]  ;;  %v2476_v47 = vld [vmem:[#allocation6 + $0x70] sm:$0xff] }
  0x2e   :  { %128 = vmatpush1.msra.mxu0 %v2374_v16  ;;  %1776 = vmatpush3.msra.mxu1 %v2416_v29  ;;  %3186 = vst [vmem:[#allocation18_spill] sm:$0xff] %v2469_v45  ;;  %v284_v48 = vld [vmem:[%s3160_s1] sm:$0x3]  ;;  %v2485_v49 = vld [vmem:[#allocation6 + $0x58] sm:$0xff]  ;;  %v2490_v50 = vld [vmem:[#allocation6 + $0x40] sm:$0xff] }
  0x2f   :  { %129 = vmatprep.subr.mxu0 %v2383_v19  ;;  %1777 = vmatprep.subr.mxu1 %v3166_v0  ;;  %v1610_v51 = vld [vmem:[%s3160_s1 + $0x2] sm:$0x3]  ;;  %v2498_v52 = vld [vmem:[#allocation6 + $0x28] sm:$0xff]  ;;  %v1619_v54 = vld [vmem:[%s3160_s1 + $0x8] sm:$0x3] }
  0x30   :  { %130 = vmatpush1.msra.mxu0 %v2389_v21  ;;  %1778 = vmatpush3.msra.mxu1 %v2426_v32  ;;  %3187 = vst [vmem:[#allocation19_spill] sm:$0xff] %v2498_v52  ;;  %v2504_v53 = vld [vmem:[#allocation6 + $0x10] sm:$0xff]  ;;  %v1625_v55 = vld [vmem:[%s3160_s1 + $0xc] sm:$0x3] }
  0x31   :  { %131 = vmatprep.subr.mxu0 %v2393_v22  ;;  %1779 = vmatprep.subr.mxu1 %v3166_v0  ;;  %3188 = vst [vmem:[#allocation20_spill] sm:$0xff] %v2504_v53  ;;  %v114_v56 = vld [vmem:[#allocation3] sm:$0x3f] }
  0x32   :  { %132 = vmatpush1.msra.mxu0 %v2399_v24  ;;  %1780 = vmatpush3.msra.mxu1 %v2436_v35  ;;  %v264_v60 = vrot.slane %v114_v56, 2 }
  0x33   :  { %133 = vmatprep.subr.mxu0 %v2403_v25  ;;  %1781 = vmatprep.subr.mxu1 %v3166_v0 }
  0x34   :  { %134 = vmatpush1.msra.mxu0 %v2409_v27  ;;  %1782 = vmatpush3.msra.mxu1 %v2446_v38 }
  0x35   :  { %135 = vmatprep.subr.mxu0 %v2413_v28  ;;  %1783 = vmatprep.subr.mxu1 %v3166_v0 }
  0x36   :  { %136 = vmatpush1.msra.mxu0 %v2419_v30  ;;  %1784 = vmatpush3.msra.mxu1 %v2456_v41 }
  0x37   :  { %137 = vmatprep.subr.mxu0 %v2423_v31  ;;  %1785 = vmatprep.subr.mxu1 %v3166_v0 }
  0x38   :  { %138 = vmatpush1.msra.mxu0 %v2429_v33  ;;  %1786 = vmatpush3.msra.mxu1 %v2466_v44 }
  0x39   :  { %139 = vmatprep.subr.mxu0 %v2433_v34  ;;  %1787 = vmatprep.subr.mxu1 %v3166_v0 }
  0x3a   :  { %140 = vmatpush1.msra.mxu0 %v2439_v36  ;;  %1788 = vmatpush3.msra.mxu1 %v2476_v47 }
  0x3b   :  { %141 = vmatprep.subr.mxu0 %v2443_v37  ;;  %1789 = vmatprep.subr.mxu1 %v3166_v0 }
  0x3c   :  { %142 = vmatpush1.msra.mxu0 %v2449_v39  ;;  %288 = vperm.xlu0 %2058, %v284_v48  }
  0x3d   :  { %143 = vmatprep.subr.mxu0 %v2453_v40  ;;  %1790 = vmatpush3.msra.mxu1 %v2485_v49 }
  0x3e   :  { %144 = vmatpush1.msra.mxu0 %v2459_v42  ;;  %1791 = vmatprep.subr.mxu1 %v3166_v0 }
  0x3f   :  { %145 = vmatprep.subr.mxu0 %v2463_v43  ;;  %1792 = vmatpush3.msra.mxu1 %v2490_v50 }
  0x40   :  { %146 = vmatpush1.msra.mxu0 %v2469_v45  ;;  %1793 = vmatprep.subr.mxu1 %v3166_v0 }
  0x41   :  { %180 = vmatmul.mubr.f32.vlgmr.msra.gmra.mxu0 %v2473_v46  ;;  %295 = vmatprep.subr.mxu0 %v2335_v2 }
  0x42   :  { %296 = vmatpush1.msra.mxu0 %v2337_v3  ;;  %470 = vperm.xlu0 %2058, %v1610_v51  }
  0x43   :  { %297 = vmatprep.subr.mxu0 %v2339_v4  ;;  %1794 = vmatpush3.msra.mxu1 %v2498_v52 }
  0x44   :  { %298 = vmatpush1.msra.mxu0 %v2342_v5  ;;  %1795 = vmatprep.subr.mxu1 %v3166_v0 }
  0x45   :  { %299 = vmatprep.subr.mxu0 %v2345_v6  ;;  %1796 = vmatpush3.msra.mxu1 %v2504_v53 }
  0x46   :  { %300 = vmatpush1.msra.mxu0 %v2348_v7  ;;  %1798 = vmatmul.mubr.f32.vlgmr.msra.gmra.mxu1 %v2473_v46 }
  0x47   :  { %1016 = vperm.xlu0 %2058, %v1619_v54   ;;  %1800 = vmatprep.subr.mxu1 %v3166_v0 }
  0x48   :  { %301 = vmatprep.subr.mxu0 %v2351_v8  ;;  %1801 = vmatpush3.msra.mxu1 %v2371_v15 }
  0x49   :  { %302 = vmatpush1.msra.mxu0 %v2354_v9  ;;  %1802 = vmatprep.subr.mxu1 %v3166_v0 }
  0x4a   :  { %303 = vmatprep.subr.mxu0 %v2357_v10  ;;  %1803 = vmatpush3.msra.mxu1 %v2380_v18 }
  0x4b   :  { %1380 = vperm.xlu0 %2058, %v1625_v55   ;;  %1804 = vmatprep.subr.mxu1 %v3166_v0  ;;  %v2585_v55 = vld [vmem:[%s3163_s4] ss:$0 sm:$0xff] }
  0x4c   :  { %304 = vmatpush1.msra.mxu0 %v2360_v11  ;;  %1805 = vmatpush3.msra.mxu1 %v2386_v20 }
  0x4d   :  { %305 = vmatprep.subr.mxu0 %v2363_v12  ;;  %1806 = vmatprep.subr.mxu1 %v3166_v0 }
  0x4e   :  { %306 = vmatpush1.msra.mxu0 %v2366_v13  ;;  %1807 = vmatpush3.msra.mxu1 %v2396_v23 }
  0x4f   :  { %307 = vmatprep.subr.mxu0 %v2369_v14  ;;  %1808 = vmatprep.subr.mxu1 %v3166_v0 }
  0x50   :  { %308 = vmatpush1.msra.mxu0 %v2374_v16  ;;  %1809 = vmatpush3.msra.mxu1 %v2406_v26 }
  0x51   :  { %309 = vmatprep.subr.mxu0 %v2383_v19  ;;  %1810 = vmatprep.subr.mxu1 %v3166_v0 }
  0x52   :  { %310 = vmatpush1.msra.mxu0 %v2389_v21  ;;  %1811 = vmatpush3.msra.mxu1 %v2416_v29 }
  0x53   :  { %311 = vmatprep.subr.mxu0 %v2393_v22  ;;  %1812 = vmatprep.subr.mxu1 %v3166_v0 }
  0x54   :  { %312 = vmatpush1.msra.mxu0 %v2399_v24  ;;  %1813 = vmatpush3.msra.mxu1 %v2426_v32 }
  0x55   :  { %313 = vmatprep.subr.mxu0 %v2403_v25  ;;  %1814 = vmatprep.subr.mxu1 %v3166_v0 }
  0x56   :  { %314 = vmatpush1.msra.mxu0 %v2409_v27  ;;  %1815 = vmatpush3.msra.mxu1 %v2436_v35 }
  0x57   :  { %315 = vmatprep.subr.mxu0 %v2413_v28  ;;  %1816 = vmatprep.subr.mxu1 %v3166_v0 }
  0x58   :  { %316 = vmatpush1.msra.mxu0 %v2419_v30  ;;  %1817 = vmatpush3.msra.mxu1 %v2446_v38 }
  0x59   :  { %317 = vmatprep.subr.mxu0 %v2423_v31  ;;  %1818 = vmatprep.subr.mxu1 %v3166_v0 }
  0x5a   :  { %318 = vmatpush1.msra.mxu0 %v2429_v33  ;;  %1819 = vmatpush3.msra.mxu1 %v2456_v41 }
  0x5b   :  { %319 = vmatprep.subr.mxu0 %v2433_v34  ;;  %1820 = vmatprep.subr.mxu1 %v3166_v0 }
  0x5c   :  { %320 = vmatpush1.msra.mxu0 %v2439_v36  ;;  %1821 = vmatpush3.msra.mxu1 %v2466_v44 }
  0x5d   :  { %321 = vmatprep.subr.mxu0 %v2443_v37  ;;  %1822 = vmatprep.subr.mxu1 %v3166_v0 }
  0x5e   :  { %322 = vmatpush1.msra.mxu0 %v2449_v39  ;;  %1823 = vmatpush3.msra.mxu1 %v2476_v47 }
  0x5f   :  { %323 = vmatprep.subr.mxu0 %v2453_v40  ;;  %1824 = vmatprep.subr.mxu1 %v3166_v0 }
  0x60   :  { %324 = vmatpush1.msra.mxu0 %v2459_v42  ;;  %1825 = vmatpush3.msra.mxu1 %v2485_v49 }
  0x61   :  { %325 = vmatprep.subr.mxu0 %v2463_v43  ;;  %1826 = vmatprep.subr.mxu1 %v3166_v0 }
  0x62   :  { %326 = vmatpush1.msra.mxu0 %v2469_v45  ;;  %1827 = vmatpush3.msra.mxu1 %v2490_v50 }
  0x63   :  { %359 = vmatprep.mubr.f32.mxu0 %v3166_v0  ;;  %1828 = vmatprep.subr.mxu1 %v3166_v0 }
  0x64   :  { %1832 = vmatprep.mubr.msk.f32.mxu1 %vm2284_vm0, %v3166_v0  ;;  %1829 = vmatpush3.msra.mxu1 %v2498_v52 }
  0x65   :  { %477 = vmatprep.subr.mxu0 %v2335_v2  ;;  %1830 = vmatprep.subr.mxu1 %v3166_v0 }
  0x66   :  { %1831 = vmatpush3.msra.mxu1 %v2504_v53 }
  0x67   :  { %1835 = vmatprep.subr.mxu1 %v3166_v0 }
  0xb7   :  { %v289_v45 = vpop.permute.xlu0 %288 }
 0x101   :  { %v181_v57 = vpop.f32.mrf.mxu0 }
 0x102   :  { %v256_v58 = vadd.f32 %v181_v57, %v114_v56 }
 0x103   :  { %v183_v61 = vpop.f32.mrf.mxu0 }
 0x104   :  { %v1606_v59 = vmul.f32 -1.442695, %v256_v58  ;;  %v266_v62 = vadd.f32 %v264_v60, %v183_v61  ;;  %v275_v58 = vrot.slane %v114_v56, 4  ;;  %v1616_v56 = vld [vmem:[%s3160_s1 + $0x6] sm:$0x3] }
 0x106   :  { %2060 = vpow2.f32 %v1606_v59  ;;  %v252_v63 = vpop.f32.mrf.mxu1  ;;  %v1607_v1 = vmul.f32 -1.442695, %v266_v62 }
 0x107   :  { %v273_v57 = vadd.f32 %v2585_v55, %v252_v63 }
 0x108   :  { %v1799_v17 = vpop.f32.mrf.mxu1  ;;  %2062 = vpow2.f32 %v1607_v1 }
 0x113   :  { %v2061_v48 = vpop.eup %2060 }
 0x114   :  { %v260_v51 = vadd.f32 1.0, %v2061_v48 }
 0x115   :  { %v2063_v54 = vpop.eup %2062 }
 0x116   :  { %2064 = vrcp.f32 %v260_v51  ;;  %v270_v0 = vadd.f32 1.0, %v2063_v54 }
 0x118   :  { %2066 = vrcp.f32 %v270_v0  ;;  %v3189_v0 = vmov 0.0  }
 0x123   :  { %v2065_v2 = vpop.eup %2064 }
 0x124   :  { %v274_v59 = vmul.f32 %v2065_v2, %v273_v57  ;;  %v3190_v2 = vld [vmem:[#allocation18_spill] sm:$0xff]  ;;  %v1622_v57 = vld [vmem:[%s3160_s1 + $0xa] sm:$0x3] }
 0x125   :  { %v2067_v61 = vpop.eup %2066 }
 0x126   :  { %v277_v60 = vadd.f32 %v275_v58, %v274_v59  ;;  %v279_v62 = vsub.f32 1.0, %v2067_v61  ;;  %v281_v48 = vmul.f32 %v2067_v61, %v2473_v46  ;;  %v1628_v58 = vld [vmem:[%s3160_s1 + $0xe] sm:$0x3]  ;;  %v294_v59 = vld [vmem:[#allocation3 + $0x6] sm:$0x3f] }
 0x128   :  { %2068 = vtanh.f32 %v277_v60 }
 0x135   :  { %v2069_v1 = vpop.eup %2068 }
 0x136   :  { %v280_v17 = vmul.f32 %v2069_v1, %v279_v62 }
 0x138   :  { %v282_v51 = vadd.f32 %v281_v48, %v280_v17  ;;  %v444_v48 = vrot.slane %v294_v59, 2 }
 0x13a   :  { %283 = vst [vmem:[#allocation8] sm:$0x3] %v282_v51  ;;  %v285_v53 = vsub.f32 %v282_v51, %v2473_v46 }
 0x13c   :  { %v291_v54 = vmul.f32 %v289_v45, %v285_v53  ;;  %v3191_v45 = vld [vmem:[#allocation20_spill] sm:$0xff]  ;;  %v1613_v53 = vld [vmem:[%s3160_s1 + $0x4] sm:$0x3] }
 0x13d   :  { %652 = vperm.xlu1 %2059, %v1613_v53  }
 0x13e   :  { %v2591_v63 = vadd.f32 %v291_v54, %v2473_v46  ;;  %v3192_v46 = vld [vmem:[#allocation15_spill] sm:$0xff] }
 0x140   :  { %360 = vmatmul.mubr.f32.vlgmr.msra.gmra.mxu0 %v2591_v63  ;;  %1833 = vmatmul.mubr.f32.vlgmr.msra.gmra.mxu1 %v2591_v63 }
 0x141   :  { %478 = vmatpush1.msra.mxu0 %v2337_v3  ;;  %1836 = vmatpush3.msra.mxu1 %v2371_v15 }
 0x142   :  { %479 = vmatprep.subr.mxu0 %v2339_v4  ;;  %1837 = vmatprep.subr.mxu1 %v3189_v0 }
 0x143   :  { %480 = vmatpush1.msra.mxu0 %v2342_v5  ;;  %1838 = vmatpush3.msra.mxu1 %v2380_v18 }
 0x144   :  { %481 = vmatprep.subr.mxu0 %v2345_v6  ;;  %1839 = vmatprep.subr.mxu1 %v3189_v0 }
 0x145   :  { %482 = vmatpush1.msra.mxu0 %v2348_v7  ;;  %1840 = vmatpush3.msra.mxu1 %v2386_v20 }
 0x146   :  { %483 = vmatprep.subr.mxu0 %v2351_v8  ;;  %1841 = vmatprep.subr.mxu1 %v3189_v0 }
 0x147   :  { %484 = vmatpush1.msra.mxu0 %v2354_v9  ;;  %1842 = vmatpush3.msra.mxu1 %v2396_v23 }
 0x148   :  { %485 = vmatprep.subr.mxu0 %v2357_v10  ;;  %1843 = vmatprep.subr.mxu1 %v3189_v0 }
 0x149   :  { %486 = vmatpush1.msra.mxu0 %v2360_v11  ;;  %1844 = vmatpush3.msra.mxu1 %v2406_v26 }
 0x14a   :  { %487 = vmatprep.subr.mxu0 %v2363_v12  ;;  %1845 = vmatprep.subr.mxu1 %v3189_v0 }
 0x14b   :  { %488 = vmatpush1.msra.mxu0 %v2366_v13  ;;  %1846 = vmatpush3.msra.mxu1 %v2416_v29 }
 0x14c   :  { %489 = vmatprep.subr.mxu0 %v2369_v14  ;;  %1847 = vmatprep.subr.mxu1 %v3189_v0 }
 0x14d   :  { %490 = vmatpush1.msra.mxu0 %v2374_v16  ;;  %1848 = vmatpush3.msra.mxu1 %v2426_v32 }
 0x14e   :  { %491 = vmatprep.subr.mxu0 %v2383_v19  ;;  %1849 = vmatprep.subr.mxu1 %v3189_v0 }
 0x14f   :  { %492 = vmatpush1.msra.mxu0 %v2389_v21  ;;  %1850 = vmatpush3.msra.mxu1 %v2436_v35 }
 0x150   :  { %493 = vmatprep.subr.mxu0 %v2393_v22  ;;  %1851 = vmatprep.subr.mxu1 %v3189_v0 }
 0x151   :  { %494 = vmatpush1.msra.mxu0 %v2399_v24  ;;  %1852 = vmatpush3.msra.mxu1 %v2446_v38 }
 0x152   :  { %495 = vmatprep.subr.mxu0 %v2403_v25  ;;  %1853 = vmatprep.subr.mxu1 %v3189_v0 }
 0x153   :  { %496 = vmatpush1.msra.mxu0 %v2409_v27  ;;  %1854 = vmatpush3.msra.mxu1 %v2456_v41 }
 0x154   :  { %497 = vmatprep.subr.mxu0 %v2413_v28  ;;  %1855 = vmatprep.subr.mxu1 %v3189_v0 }
 0x155   :  { %498 = vmatpush1.msra.mxu0 %v2419_v30  ;;  %1856 = vmatpush3.msra.mxu1 %v2466_v44 }
 0x156   :  { %499 = vmatprep.subr.mxu0 %v2423_v31  ;;  %1857 = vmatprep.subr.mxu1 %v3189_v0 }
 0x157   :  { %500 = vmatpush1.msra.mxu0 %v2429_v33  ;;  %1858 = vmatpush3.msra.mxu1 %v2476_v47 }
 0x158   :  { %501 = vmatprep.subr.mxu0 %v2433_v34  ;;  %1859 = vmatprep.subr.mxu1 %v3189_v0 }
 0x159   :  { %502 = vmatpush1.msra.mxu0 %v2439_v36  ;;  %1860 = vmatpush3.msra.mxu1 %v2485_v49 }
 0x15a   :  { %503 = vmatprep.subr.mxu0 %v2443_v37  ;;  %1861 = vmatprep.subr.mxu1 %v3189_v0 }
 0x15b   :  { %504 = vmatpush1.msra.mxu0 %v2449_v39  ;;  %1862 = vmatpush3.msra.mxu1 %v2490_v50 }
 0x15c   :  { %505 = vmatprep.subr.mxu0 %v2453_v40  ;;  %1863 = vmatprep.subr.mxu1 %v3189_v0 }
 0x15d   :  { %506 = vmatpush1.msra.mxu0 %v2459_v42  ;;  %1864 = vmatpush3.msra.mxu1 %v2498_v52 }
 0x15e   :  { %507 = vmatprep.subr.mxu0 %v2463_v43  ;;  %1865 = vmatprep.subr.mxu1 %v3189_v0 }
 0x15f   :  { %508 = vmatpush1.msra.mxu0 %v3190_v2  ;;  %541 = vmatprep.mubr.f32.mxu0 %v3189_v0  ;;  %v455_v2 = vrot.slane %v294_v59, 4 }
 0x160   :  { %1866 = vmatpush3.msra.mxu1 %v3191_v45  ;;  %1867 = vmatprep.mubr.msk.f32.mxu1 %vm2284_vm0, %v3189_v0 }
 0x161   :  { %659 = vmatprep.subr.mxu0 %v3192_v46  ;;  %1870 = vmatprep.subr.mxu1 %v3189_v0 }
 0x162   :  { %834 = vperm.xlu1 %2059, %v1616_v56  }
 0x166   :  { %1198 = vperm.xlu1 %2059, %v1622_v57  }
 0x16a   :  { %1562 = vperm.xlu1 %2059, %v1628_v58  }
 0x200   :  { %v361_v60 = vpop.f32.mrf.mxu0  ;;  %v432_v61 = vpop.f32.mrf.mxu1 }
 0x201   :  { %v436_v62 = vadd.f32 %v361_v60, %v294_v59  ;;  %v453_v58 = vadd.f32 %v2585_v55, %v432_v61  ;;  %v476_v61 = vld [vmem:[#allocation3 + $0xc] sm:$0x3f] }
 0x202   :  { %v1834_v1 = vpop.f32.mrf.mxu1  ;;  %v363_v51 = vpop.f32.mrf.mxu0 }
 0x203   :  { %v1608_v17 = vmul.f32 -1.442695, %v436_v62  ;;  %v446_v54 = vadd.f32 %v444_v48, %v363_v51 }
 0x205   :  { %2070 = vpow2.f32 %v1608_v17  ;;  %v1609_v53 = vmul.f32 -1.442695, %v446_v54  ;;  %v471_v54 = vpop.permute.xlu0 %470 }
 0x207   :  { %2072 = vpow2.f32 %v1609_v53 }
 0x212   :  { %v2071_v56 = vpop.eup %2070 }
 0x213   :  { %v440_v46 = vadd.f32 1.0, %v2071_v56 }
 0x214   :  { %v2073_v57 = vpop.eup %2072 }
 0x215   :  { %2074 = vrcp.f32 %v440_v46  ;;  %v450_v45 = vadd.f32 1.0, %v2073_v57 }
 0x217   :  { %2076 = vrcp.f32 %v450_v45  ;;  %v3198_v45 = vld [vmem:[#allocation15_spill] sm:$0xff] }
 0x222   :  { %v2075_v43 = vpop.eup %2074 }
 0x223   :  { %v454_v52 = vmul.f32 %v2075_v43, %v453_v58  ;;  %v3194_v43 = vld [vmem:[#allocation19_spill] sm:$0xff] }
 0x224   :  { %v2077_v62 = vpop.eup %2076 }
 0x225   :  { %v457_v60 = vadd.f32 %v455_v2, %v454_v52  ;;  %v459_v1 = vsub.f32 1.0, %v2077_v62  ;;  %v461_v17 = vmul.f32 %v2077_v62, %v2591_v63  ;;  %v3195_v52 = vld [vmem:[#allocation17_spill] sm:$0xff]  ;;  %v3197_v2 = vld [vmem:[#allocation20_spill] sm:$0xff] }
 0x227   :  { %2078 = vtanh.f32 %v457_v60 }
 0x234   :  { %v2079_v42 = vpop.eup %2078 }
 0x235   :  { %v460_v48 = vmul.f32 %v2079_v42, %v459_v1  ;;  %v3193_v42 = vld [vmem:[#allocation16_spill] sm:$0xff]  ;;  %v626_v1 = vrot.slane %v476_v61, 2 }
 0x237   :  { %v462_v51 = vadd.f32 %v461_v17, %v460_v48 }
 0x239   :  { %464 = vst [vmem:[#allocation8 + $0x2] sm:$0x3] %v462_v51  ;;  %v467_v46 = vsub.f32 %v462_v51, %v2591_v63 }
 0x23b   :  { %v473_v53 = vmul.f32 %v471_v54, %v467_v46 }
 0x23d   :  { %v2678_v59 = vadd.f32 %v473_v53, %v2591_v63  ;;  %v3196_v63 = vld [vmem:[#allocation18_spill] sm:$0xff] }
 0x23f   :  { %542 = vmatmul.mubr.f32.vlgmr.msra.gmra.mxu0 %v2678_v59  ;;  %1868 = vmatmul.mubr.f32.vlgmr.msra.gmra.mxu1 %v2678_v59 }
 0x240   :  { %660 = vmatpush1.msra.mxu0 %v2337_v3  ;;  %1871 = vmatpush3.msra.mxu1 %v2371_v15 }
 0x241   :  { %661 = vmatprep.subr.mxu0 %v2339_v4  ;;  %1872 = vmatprep.subr.mxu1 %v3189_v0 }
 0x242   :  { %662 = vmatpush1.msra.mxu0 %v2342_v5  ;;  %1873 = vmatpush3.msra.mxu1 %v2380_v18 }
 0x243   :  { %663 = vmatprep.subr.mxu0 %v2345_v6  ;;  %1874 = vmatprep.subr.mxu1 %v3189_v0 }
 0x244   :  { %664 = vmatpush1.msra.mxu0 %v2348_v7  ;;  %1875 = vmatpush3.msra.mxu1 %v2386_v20 }
 0x245   :  { %665 = vmatprep.subr.mxu0 %v2351_v8  ;;  %1876 = vmatprep.subr.mxu1 %v3189_v0 }
 0x246   :  { %666 = vmatpush1.msra.mxu0 %v2354_v9  ;;  %1877 = vmatpush3.msra.mxu1 %v2396_v23 }
 0x247   :  { %667 = vmatprep.subr.mxu0 %v2357_v10  ;;  %1878 = vmatprep.subr.mxu1 %v3189_v0 }
 0x248   :  { %668 = vmatpush1.msra.mxu0 %v2360_v11  ;;  %1879 = vmatpush3.msra.mxu1 %v2406_v26 }
 0x249   :  { %669 = vmatprep.subr.mxu0 %v2363_v12  ;;  %1880 = vmatprep.subr.mxu1 %v3189_v0 }
 0x24a   :  { %670 = vmatpush1.msra.mxu0 %v2366_v13  ;;  %1881 = vmatpush3.msra.mxu1 %v2416_v29 }
 0x24b   :  { %671 = vmatprep.subr.mxu0 %v2369_v14  ;;  %1882 = vmatprep.subr.mxu1 %v3189_v0 }
 0x24c   :  { %672 = vmatpush1.msra.mxu0 %v2374_v16  ;;  %1883 = vmatpush3.msra.mxu1 %v2426_v32 }
 0x24d   :  { %673 = vmatprep.subr.mxu0 %v2383_v19  ;;  %1884 = vmatprep.subr.mxu1 %v3189_v0 }
 0x24e   :  { %674 = vmatpush1.msra.mxu0 %v2389_v21  ;;  %1885 = vmatpush3.msra.mxu1 %v2436_v35 }
 0x24f   :  { %675 = vmatprep.subr.mxu0 %v2393_v22  ;;  %1886 = vmatprep.subr.mxu1 %v3189_v0 }
 0x250   :  { %676 = vmatpush1.msra.mxu0 %v2399_v24  ;;  %1887 = vmatpush3.msra.mxu1 %v2446_v38 }
 0x251   :  { %677 = vmatprep.subr.mxu0 %v2403_v25  ;;  %1888 = vmatprep.subr.mxu1 %v3189_v0 }
 0x252   :  { %678 = vmatpush1.msra.mxu0 %v2409_v27  ;;  %1889 = vmatpush3.msra.mxu1 %v2456_v41 }
 0x253   :  { %679 = vmatprep.subr.mxu0 %v2413_v28  ;;  %1890 = vmatprep.subr.mxu1 %v3189_v0 }
 0x254   :  { %680 = vmatpush1.msra.mxu0 %v2419_v30  ;;  %1891 = vmatpush3.msra.mxu1 %v2466_v44 }
 0x255   :  { %681 = vmatprep.subr.mxu0 %v2423_v31  ;;  %1892 = vmatprep.subr.mxu1 %v3189_v0 }
 0x256   :  { %682 = vmatpush1.msra.mxu0 %v2429_v33  ;;  %1893 = vmatpush3.msra.mxu1 %v2476_v47 }
 0x257   :  { %683 = vmatprep.subr.mxu0 %v2433_v34  ;;  %1894 = vmatprep.subr.mxu1 %v3189_v0 }
 0x258   :  { %684 = vmatpush1.msra.mxu0 %v2439_v36  ;;  %1895 = vmatpush3.msra.mxu1 %v2485_v49 }
 0x259   :  { %685 = vmatprep.subr.mxu0 %v2443_v37  ;;  %1896 = vmatprep.subr.mxu1 %v3189_v0 }
 0x25a   :  { %686 = vmatpush1.msra.mxu0 %v2449_v39  ;;  %1897 = vmatpush3.msra.mxu1 %v2490_v50 }
 0x25b   :  { %687 = vmatprep.subr.mxu0 %v2453_v40  ;;  %1898 = vmatprep.subr.mxu1 %v3189_v0 }
 0x25c   :  { %688 = vmatpush1.msra.mxu0 %v3193_v42  ;;  %1899 = vmatpush3.msra.mxu1 %v3194_v43 }
 0x25d   :  { %689 = vmatprep.subr.mxu0 %v3195_v52  ;;  %1900 = vmatprep.subr.mxu1 %v3189_v0 }
 0x25e   :  { %690 = vmatpush1.msra.mxu0 %v3196_v63  ;;  %723 = vmatprep.mubr.f32.mxu0 %v3189_v0 }
 0x25f   :  { %1901 = vmatpush3.msra.mxu1 %v3197_v2  ;;  %1902 = vmatprep.mubr.msk.f32.mxu1 %vm2284_vm0, %v3189_v0 }
 0x260   :  { %841 = vmatprep.subr.mxu0 %v3198_v45  ;;  %1905 = vmatprep.subr.mxu1 %v3189_v0  ;;  %v637_v45 = vrot.slane %v476_v61, 4 }
 0x2ff   :  { %v543_v56 = vpop.f32.mrf.mxu0  ;;  %v614_v57 = vpop.f32.mrf.mxu1 }
 0x300   :  { %v618_v58 = vadd.f32 %v543_v56, %v476_v61  ;;  %v635_v63 = vadd.f32 %v2585_v55, %v614_v57  ;;  %v2852_v57 = vld [vmem:[#allocation6 + $0x138] sm:$0xff] }
 0x301   :  { %v1869_v60 = vpop.f32.mrf.mxu1  ;;  %v545_v17 = vpop.f32.mrf.mxu0 }
 0x302   :  { %v1611_v62 = vmul.f32 -1.442695, %v618_v58  ;;  %v628_v48 = vadd.f32 %v626_v1, %v545_v17 }
 0x304   :  { %2080 = vpow2.f32 %v1611_v62  ;;  %v1612_v51 = vmul.f32 -1.442695, %v628_v48 }
 0x306   :  { %2082 = vpow2.f32 %v1612_v51  ;;  %v653_v51 = vpop.permute.xlu1 %652 }
 0x311   :  { %v2081_v46 = vpop.eup %2080 }
 0x312   :  { %v622_v54 = vadd.f32 1.0, %v2081_v46 }
 0x313   :  { %v2083_v53 = vpop.eup %2082 }
 0x314   :  { %2084 = vrcp.f32 %v622_v54  ;;  %v632_v2 = vadd.f32 1.0, %v2083_v53  ;;  %v2855_v54 = vld [vmem:[#allocation6 + $0x148] sm:$0xff] }
 0x315   :  { %v2858_v53 = vld [vmem:[#allocation6 + $0x128] sm:$0xff] }
 0x316   :  { %2086 = vrcp.f32 %v632_v2  ;;  %v2845_v2 = vld [vmem:[#allocation6 + $0x160] sm:$0xff] }
 0x321   :  { %v2085_v52 = vpop.eup %2084 }
 0x322   :  { %v636_v43 = vmul.f32 %v2085_v52, %v635_v63  ;;  %v2838_v52 = vld [vmem:[#allocation6 + $0x158] sm:$0xff]  ;;  %v2842_v63 = vld [vmem:[#allocation6 + $0x150] sm:$0xff] }
 0x323   :  { %v2087_v58 = vpop.eup %2086 }
 0x324   :  { %v639_v56 = vadd.f32 %v637_v45, %v636_v43  ;;  %v641_v60 = vsub.f32 1.0, %v2087_v58  ;;  %v643_v1 = vmul.f32 %v2087_v58, %v2678_v59  ;;  %v2835_v43 = vld [vmem:[#allocation6 + $0x178] sm:$0xff]  ;;  %v2848_v45 = vld [vmem:[#allocation6 + $0x140] sm:$0xff]  ;;  %v2865_v58 = vld [vmem:[#allocation6 + $0x130] sm:$0xff] }
 0x326   :  { %2088 = vtanh.f32 %v639_v56  ;;  %v2862_v56 = vld [vmem:[#allocation6 + $0x120] sm:$0xff] }
 0x333   :  { %v2089_v42 = vpop.eup %2088 }
 0x334   :  { %v642_v62 = vmul.f32 %v2089_v42, %v641_v60  ;;  %v2832_v42 = vld [vmem:[#allocation6 + $0x168] sm:$0xff]  ;;  %v2868_v60 = vld [vmem:[#allocation6 + $0x110] sm:$0xff] }
 0x336   :  { %v644_v17 = vadd.f32 %v643_v1, %v642_v62  ;;  %v2872_v62 = vld [vmem:[#allocation6 + $0x108] sm:$0xff]  ;;  %v2875_v1 = vld [vmem:[#allocation6 + $0x118] sm:$0xff] }
 0x338   :  { %646 = vst [vmem:[#allocation8 + $0x4] sm:$0x3] %v644_v17  ;;  %v649_v48 = vsub.f32 %v644_v17, %v2678_v59  ;;  %v2878_v17 = vld [vmem:[#allocation6 + $0xf8] sm:$0xff] }
 0x33a   :  { %v655_v46 = vmul.f32 %v653_v51, %v649_v48  ;;  %v2882_v48 = vld [vmem:[#allocation6 + $0xf0] sm:$0xff]  ;;  %v2885_v51 = vld [vmem:[#allocation6 + $0x100] sm:$0xff] }
 0x33c   :  { %v2753_v61 = vadd.f32 %v655_v46, %v2678_v59  ;;  %v2888_v46 = vld [vmem:[#allocation6 + $0xe0] sm:$0xff] }
 0x33e   :  { %724 = vmatmul.mubr.f32.vlgmr.msra.gmra.mxu0 %v2753_v61  ;;  %1903 = vmatmul.mubr.f32.vlgmr.msra.gmra.mxu1 %v2753_v61 }
 0x33f   :  { %842 = vmatpush1.msra.mxu0 %v2337_v3  ;;  %1906 = vmatpush3.msra.mxu1 %v2371_v15  ;;  %v3199_v3 = vld [vmem:[#allocation16_spill] sm:$0xff] }
 0x340   :  { %843 = vmatprep.subr.mxu0 %v2339_v4  ;;  %1907 = vmatprep.subr.mxu1 %v3189_v0  ;;  %v3200_v4 = vld [vmem:[#allocation19_spill] sm:$0xff] }
 0x341   :  { %844 = vmatpush1.msra.mxu0 %v2342_v5  ;;  %1908 = vmatpush3.msra.mxu1 %v2380_v18  ;;  %v3201_v5 = vld [vmem:[#allocation17_spill] sm:$0xff] }
 0x342   :  { %845 = vmatprep.subr.mxu0 %v2345_v6  ;;  %1909 = vmatprep.subr.mxu1 %v3189_v0  ;;  %v3202_v6 = vld [vmem:[#allocation18_spill] sm:$0xff] }
 0x343   :  { %846 = vmatpush1.msra.mxu0 %v2348_v7  ;;  %1910 = vmatpush3.msra.mxu1 %v2386_v20  ;;  %v3203_v7 = vld [vmem:[#allocation20_spill] sm:$0xff] }
 0x344   :  { %847 = vmatprep.subr.mxu0 %v2351_v8  ;;  %1911 = vmatprep.subr.mxu1 %v3189_v0  ;;  %v3204_v8 = vld [vmem:[#allocation15_spill] sm:$0xff] }
 0x345   :  { %848 = vmatpush1.msra.mxu0 %v2354_v9  ;;  %1912 = vmatpush3.msra.mxu1 %v2396_v23  ;;  %v658_v9 = vld [vmem:[#allocation3 + $0x12] sm:$0x3f] }
 0x346   :  { %849 = vmatprep.subr.mxu0 %v2357_v10  ;;  %1913 = vmatprep.subr.mxu1 %v3189_v0  ;;  %v808_v15 = vrot.slane %v658_v9, 2 }
 0x347   :  { %850 = vmatpush1.msra.mxu0 %v2360_v11  ;;  %1914 = vmatpush3.msra.mxu1 %v2406_v26 }
 0x348   :  { %851 = vmatprep.subr.mxu0 %v2363_v12  ;;  %1915 = vmatprep.subr.mxu1 %v3189_v0 }
 0x349   :  { %852 = vmatpush1.msra.mxu0 %v2366_v13  ;;  %1916 = vmatpush3.msra.mxu1 %v2416_v29 }
 0x34a   :  { %853 = vmatprep.subr.mxu0 %v2369_v14  ;;  %1917 = vmatprep.subr.mxu1 %v3189_v0 }
 0x34b   :  { %854 = vmatpush1.msra.mxu0 %v2374_v16  ;;  %1918 = vmatpush3.msra.mxu1 %v2426_v32 }
 0x34c   :  { %855 = vmatprep.subr.mxu0 %v2383_v19  ;;  %1919 = vmatprep.subr.mxu1 %v3189_v0 }
 0x34d   :  { %856 = vmatpush1.msra.mxu0 %v2389_v21  ;;  %1920 = vmatpush3.msra.mxu1 %v2436_v35 }
 0x34e   :  { %857 = vmatprep.subr.mxu0 %v2393_v22  ;;  %1921 = vmatprep.subr.mxu1 %v3189_v0 }
 0x34f   :  { %858 = vmatpush1.msra.mxu0 %v2399_v24  ;;  %1922 = vmatpush3.msra.mxu1 %v2446_v38  ;;  %v819_v24 = vrot.slane %v658_v9, 4 }
 0x350   :  { %859 = vmatprep.subr.mxu0 %v2403_v25  ;;  %1923 = vmatprep.subr.mxu1 %v3189_v0 }
 0x351   :  { %860 = vmatpush1.msra.mxu0 %v2409_v27  ;;  %1924 = vmatpush3.msra.mxu1 %v2456_v41 }
 0x352   :  { %861 = vmatprep.subr.mxu0 %v2413_v28  ;;  %1925 = vmatprep.subr.mxu1 %v3189_v0 }
 0x353   :  { %862 = vmatpush1.msra.mxu0 %v2419_v30  ;;  %1926 = vmatpush3.msra.mxu1 %v2466_v44 }
 0x354   :  { %863 = vmatprep.subr.mxu0 %v2423_v31  ;;  %1927 = vmatprep.subr.mxu1 %v3189_v0 }
 0x355   :  { %864 = vmatpush1.msra.mxu0 %v2429_v33  ;;  %1928 = vmatpush3.msra.mxu1 %v2476_v47 }
 0x356   :  { %865 = vmatprep.subr.mxu0 %v2433_v34  ;;  %1929 = vmatprep.subr.mxu1 %v3189_v0 }
 0x357   :  { %866 = vmatpush1.msra.mxu0 %v2439_v36  ;;  %1930 = vmatpush3.msra.mxu1 %v2485_v49 }
 0x358   :  { %867 = vmatprep.subr.mxu0 %v2443_v37  ;;  %1931 = vmatprep.subr.mxu1 %v3189_v0 }
 0x359   :  { %868 = vmatpush1.msra.mxu0 %v2449_v39  ;;  %1932 = vmatpush3.msra.mxu1 %v2490_v50  ;;  %v835_v39 = vpop.permute.xlu1 %834 }
 0x35a   :  { %869 = vmatprep.subr.mxu0 %v2453_v40  ;;  %1933 = vmatprep.subr.mxu1 %v3189_v0 }
 0x35b   :  { %870 = vmatpush1.msra.mxu0 %v3199_v3  ;;  %1934 = vmatpush3.msra.mxu1 %v3200_v4  ;;  %v2896_v3 = vld [vmem:[#allocation6 + $0xc8] sm:$0xff] }
 0x35c   :  { %871 = vmatprep.subr.mxu0 %v3201_v5  ;;  %1935 = vmatprep.subr.mxu1 %v3189_v0  ;;  %v2900_v5 = vld [vmem:[#allocation6 + $0xc0] sm:$0xff] }
 0x35d   :  { %872 = vmatpush1.msra.mxu0 %v3202_v6  ;;  %905 = vmatprep.mubr.f32.mxu0 %v3189_v0  ;;  %v2904_v6 = vld [vmem:[#allocation6 + $0xb0] sm:$0xff] }
 0x35e   :  { %1936 = vmatpush3.msra.mxu1 %v3203_v7  ;;  %1937 = vmatprep.mubr.msk.f32.mxu1 %vm2284_vm0, %v3189_v0 }
 0x35f   :  { %1023 = vmatprep.subr.mxu0 %v3204_v8  ;;  %1940 = vmatprep.subr.mxu1 %v3189_v0  ;;  %v2908_v8 = vld [vmem:[#allocation6 + $0xa8] sm:$0xff] }
 0x3fe   :  { %v725_v10 = vpop.f32.mrf.mxu0  ;;  %v796_v11 = vpop.f32.mrf.mxu1 }
 0x3ff   :  { %v800_v12 = vadd.f32 %v725_v10, %v658_v9  ;;  %v817_v25 = vadd.f32 %v2585_v55, %v796_v11  ;;  %v2916_v9 = vld [vmem:[#allocation6 + $0x90] sm:$0xff]  ;;  %v2924_v10 = vld [vmem:[#allocation6 + $0x78] sm:$0xff]  ;;  %v2932_v11 = vld [vmem:[#allocation6 + $0x60] sm:$0xff] }
 0x400   :  { %v1904_v13 = vpop.f32.mrf.mxu1  ;;  %v727_v16 = vpop.f32.mrf.mxu0 }
 0x401   :  { %v1614_v14 = vmul.f32 -1.442695, %v800_v12  ;;  %v810_v18 = vadd.f32 %v808_v15, %v727_v16  ;;  %v2940_v12 = vld [vmem:[#allocation6 + $0x48] sm:$0xff]  ;;  %v2948_v13 = vld [vmem:[#allocation6 + $0x30] sm:$0xff]  ;;  %v2964_v15 = vld [vmem:[#allocation6] sm:$0xff] }
 0x402   :  { %3206 = vst [vmem:[#allocation19_spill] sm:$0xff] %v2964_v15 }
 0x403   :  { %2090 = vpow2.f32 %v1614_v14  ;;  %v1615_v19 = vmul.f32 -1.442695, %v810_v18  ;;  %v2956_v14 = vld [vmem:[#allocation6 + $0x18] sm:$0xff] }
 0x405   :  { %2092 = vpow2.f32 %v1615_v19 }
 0x410   :  { %v2091_v20 = vpop.eup %2090 }
 0x411   :  { %v804_v21 = vadd.f32 1.0, %v2091_v20 }
 0x412   :  { %v2093_v22 = vpop.eup %2092 }
 0x413   :  { %2094 = vrcp.f32 %v804_v21  ;;  %v814_v23 = vadd.f32 1.0, %v2093_v22 }
 0x415   :  { %2096 = vrcp.f32 %v814_v23 }
 0x420   :  { %v2095_v26 = vpop.eup %2094 }
 0x421   :  { %v818_v27 = vmul.f32 %v2095_v26, %v817_v25 }
 0x422   :  { %v2097_v29 = vpop.eup %2096 }
 0x423   :  { %v821_v28 = vadd.f32 %v819_v24, %v818_v27  ;;  %v823_v30 = vsub.f32 1.0, %v2097_v29  ;;  %v825_v33 = vmul.f32 %v2097_v29, %v2753_v61 }
 0x425   :  { %2098 = vtanh.f32 %v821_v28 }
 0x432   :  { %v2099_v31 = vpop.eup %2098 }
 0x433   :  { %v824_v34 = vmul.f32 %v2099_v31, %v823_v30 }
 0x435   :  { %v826_v36 = vadd.f32 %v825_v33, %v824_v34 }
 0x437   :  { %828 = vst [vmem:[#allocation8 + $0x6] sm:$0x3] %v826_v36  ;;  %v831_v37 = vsub.f32 %v826_v36, %v2753_v61 }
 0x439   :  { %v837_v40 = vmul.f32 %v835_v39, %v831_v37 }
 0x43b   :  { %v2828_v59 = vadd.f32 %v837_v40, %v2753_v61  ;;  %v2892_v61 = vld [vmem:[#allocation6 + $0xd8] sm:$0xff] }
 0x43d   :  { %906 = vmatmul.mubr.f32.vlgmr.msra.gmra.mxu0 %v2828_v59  ;;  %1938 = vmatmul.mubr.f32.vlgmr.msra.gmra.mxu1 %v2828_v59 }
 0x43e   :  { %1024 = vmatpush1.msra.mxu0 %v2832_v42  ;;  %1941 = vmatpush3.msra.mxu1 %v2835_v43 }
 0x43f   :  { %1025 = vmatprep.subr.mxu0 %v2838_v52  ;;  %1942 = vmatprep.subr.mxu1 %v3189_v0 }
 0x440   :  { %1026 = vmatpush1.msra.mxu0 %v2842_v63  ;;  %1943 = vmatpush3.msra.mxu1 %v2845_v2 }
 0x441   :  { %1027 = vmatprep.subr.mxu0 %v2848_v45  ;;  %1944 = vmatprep.subr.mxu1 %v3189_v0 }
 0x442   :  { %1028 = vmatpush1.msra.mxu0 %v2852_v57  ;;  %1945 = vmatpush3.msra.mxu1 %v2855_v54 }
 0x443   :  { %1029 = vmatprep.subr.mxu0 %v2858_v53  ;;  %1946 = vmatprep.subr.mxu1 %v3189_v0 }
 0x444   :  { %1030 = vmatpush1.msra.mxu0 %v2862_v56  ;;  %1947 = vmatpush3.msra.mxu1 %v2865_v58 }
 0x445   :  { %1031 = vmatprep.subr.mxu0 %v2868_v60  ;;  %1948 = vmatprep.subr.mxu1 %v3189_v0 }
 0x446   :  { %1032 = vmatpush1.msra.mxu0 %v2872_v62  ;;  %1949 = vmatpush3.msra.mxu1 %v2875_v1 }
 0x447   :  { %1033 = vmatprep.subr.mxu0 %v2878_v17  ;;  %1950 = vmatprep.subr.mxu1 %v3189_v0 }
 0x448   :  { %1034 = vmatpush1.msra.mxu0 %v2882_v48  ;;  %1951 = vmatpush3.msra.mxu1 %v2885_v51 }
 0x449   :  { %1035 = vmatprep.subr.mxu0 %v2888_v46  ;;  %1952 = vmatprep.subr.mxu1 %v3189_v0 }
 0x44a   :  { %1036 = vmatpush1.msra.mxu0 %v2892_v61  ;;  %1953 = vmatpush3.msra.mxu1 %v2426_v32  ;;  %v2912_v32 = vld [vmem:[#allocation6 + $0x98] sm:$0xff] }
 0x44b   :  { %1037 = vmatprep.subr.mxu0 %v2896_v3  ;;  %1954 = vmatprep.subr.mxu1 %v3189_v0 }
 0x44c   :  { %1038 = vmatpush1.msra.mxu0 %v2900_v5  ;;  %1955 = vmatpush3.msra.mxu1 %v2436_v35  ;;  %v2920_v35 = vld [vmem:[#allocation6 + $0x80] sm:$0xff] }
 0x44d   :  { %1039 = vmatprep.subr.mxu0 %v2904_v6  ;;  %1956 = vmatprep.subr.mxu1 %v3189_v0 }
 0x44e   :  { %1040 = vmatpush1.msra.mxu0 %v2908_v8  ;;  %1957 = vmatpush3.msra.mxu1 %v2446_v38  ;;  %v2928_v38 = vld [vmem:[#allocation6 + $0x68] sm:$0xff] }
 0x44f   :  { %1041 = vmatprep.subr.mxu0 %v2912_v32  ;;  %1958 = vmatprep.subr.mxu1 %v3189_v0 }
 0x450   :  { %1042 = vmatpush1.msra.mxu0 %v2916_v9  ;;  %1959 = vmatpush3.msra.mxu1 %v2456_v41  ;;  %v2936_v41 = vld [vmem:[#allocation6 + $0x50] sm:$0xff] }
 0x451   :  { %1043 = vmatprep.subr.mxu0 %v2920_v35  ;;  %1960 = vmatprep.subr.mxu1 %v3189_v0 }
 0x452   :  { %1044 = vmatpush1.msra.mxu0 %v2924_v10  ;;  %1961 = vmatpush3.msra.mxu1 %v2466_v44  ;;  %v2944_v44 = vld [vmem:[#allocation6 + $0x38] sm:$0xff] }
 0x453   :  { %1045 = vmatprep.subr.mxu0 %v2928_v38  ;;  %1962 = vmatprep.subr.mxu1 %v3189_v0 }
 0x454   :  { %1046 = vmatpush1.msra.mxu0 %v2932_v11  ;;  %1963 = vmatpush3.msra.mxu1 %v2476_v47  ;;  %v2952_v47 = vld [vmem:[#allocation6 + $0x20] sm:$0xff] }
 0x455   :  { %1047 = vmatprep.subr.mxu0 %v2936_v41  ;;  %1964 = vmatprep.subr.mxu1 %v3189_v0 }
 0x456   :  { %1048 = vmatpush1.msra.mxu0 %v2940_v12  ;;  %1965 = vmatpush3.msra.mxu1 %v2485_v49  ;;  %v2960_v49 = vld [vmem:[#allocation6 + $0x8] sm:$0xff] }
 0x457   :  { %1049 = vmatprep.subr.mxu0 %v2944_v44  ;;  %1966 = vmatprep.subr.mxu1 %v3189_v0  ;;  %3205 = vst [vmem:[#allocation16_spill] sm:$0xff] %v2960_v49 }
 0x458   :  { %1050 = vmatpush1.msra.mxu0 %v2948_v13  ;;  %1967 = vmatpush3.msra.mxu1 %v2490_v50  ;;  %v2971_v50 = vld [vmem:[#allocation6 + $0x170] sm:$0xff] }
 0x459   :  { %1051 = vmatprep.subr.mxu0 %v2952_v47  ;;  %1968 = vmatprep.subr.mxu1 %v3189_v0 }
 0x45a   :  { %1052 = vmatpush1.msra.mxu0 %v2956_v14  ;;  %1969 = vmatpush3.msra.mxu1 %v3200_v4  ;;  %v840_v4 = vld [vmem:[#allocation3 + $0x18] sm:$0x3f] }
 0x45b   :  { %1053 = vmatprep.subr.mxu0 %v2960_v49  ;;  %1970 = vmatprep.subr.mxu1 %v3189_v0  ;;  %v990_v22 = vrot.slane %v840_v4, 2  ;;  %v1001_v29 = vrot.slane %v840_v4, 4 }
 0x45c   :  { %1054 = vmatpush1.msra.mxu0 %v2964_v15  ;;  %1087 = vmatprep.mubr.f32.mxu0 %v3189_v0 }
 0x45d   :  { %1971 = vmatpush3.msra.mxu1 %v3203_v7  ;;  %1972 = vmatprep.mubr.msk.f32.mxu1 %vm2284_vm0, %v3189_v0 }
 0x45e   :  { %1205 = vmatprep.subr.mxu0 %v2971_v50  ;;  %1975 = vmatprep.subr.mxu1 %v3189_v0 }
 0x4fd   :  { %v907_v16 = vpop.f32.mrf.mxu0  ;;  %v978_v18 = vpop.f32.mrf.mxu1 }
 0x4fe   :  { %v982_v19 = vadd.f32 %v907_v16, %v840_v4  ;;  %v999_v30 = vadd.f32 %v2585_v55, %v978_v18  ;;  %v3008_v55 = vld [vmem:[#allocation6 + $0xe8] sm:$0xff]  ;;  %v3020_v18 = vld [vmem:[#allocation6 + $0xb8] sm:$0xff] }
 0x4ff   :  { %v1939_v20 = vpop.f32.mrf.mxu1  ;;  %v909_v23 = vpop.f32.mrf.mxu0 }
 0x500   :  { %v1617_v21 = vmul.f32 -1.442695, %v982_v19  ;;  %v992_v24 = vadd.f32 %v990_v22, %v909_v23  ;;  %v3026_v23 = vld [vmem:[#allocation6 + $0xa0] sm:$0xff] }
 0x502   :  { %2100 = vpow2.f32 %v1617_v21  ;;  %v1618_v7 = vmul.f32 -1.442695, %v992_v24  ;;  %v1017_v21 = vpop.permute.xlu0 %1016  ;;  %v3032_v24 = vld [vmem:[#allocation6 + $0x88] sm:$0xff] }
 0x504   :  { %2102 = vpow2.f32 %v1618_v7  ;;  %v3038_v7 = vld [vmem:[#allocation6 + $0x70] sm:$0xff] }
 0x50f   :  { %v2101_v25 = vpop.eup %2100 }
 0x510   :  { %v986_v26 = vadd.f32 1.0, %v2101_v25  ;;  %v3044_v25 = vld [vmem:[#allocation6 + $0x58] sm:$0xff] }
 0x511   :  { %v2103_v27 = vpop.eup %2102 }
 0x512   :  { %2104 = vrcp.f32 %v986_v26  ;;  %v996_v28 = vadd.f32 1.0, %v2103_v27  ;;  %v3050_v26 = vld [vmem:[#allocation6 + $0x40] sm:$0xff]  ;;  %v3056_v27 = vld [vmem:[#allocation6 + $0x28] sm:$0xff] }
 0x514   :  { %2106 = vrcp.f32 %v996_v28  ;;  %v3063_v28 = vld [vmem:[#allocation6 + $0x10] sm:$0xff] }
 0x515   :  { %3207 = vst [vmem:[#allocation17_spill] sm:$0xff] %v3063_v28 }
 0x51f   :  { %v2105_v31 = vpop.eup %2104 }
 0x520   :  { %v1000_v33 = vmul.f32 %v2105_v31, %v999_v30 }
 0x521   :  { %v2107_v36 = vpop.eup %2106 }
 0x522   :  { %v1003_v34 = vadd.f32 %v1001_v29, %v1000_v33  ;;  %v1005_v37 = vsub.f32 1.0, %v2107_v36  ;;  %v1007_v40 = vmul.f32 %v2107_v36, %v2828_v59  ;;  %v1022_v29 = vld [vmem:[#allocation3 + $0x1e] sm:$0x3f] }
 0x524   :  { %2108 = vtanh.f32 %v1003_v34 }
 0x531   :  { %v2109_v39 = vpop.eup %2108 }
 0x532   :  { %v1006_v16 = vmul.f32 %v2109_v39, %v1005_v37  ;;  %v1172_v37 = vrot.slane %v1022_v29, 2 }
 0x534   :  { %v1008_v19 = vadd.f32 %v1007_v40, %v1006_v16 }
 0x536   :  { %1010 = vst [vmem:[#allocation8 + $0x8] sm:$0x3] %v1008_v19  ;;  %v1013_v20 = vsub.f32 %v1008_v19, %v2828_v59 }
 0x538   :  { %v1019_v22 = vmul.f32 %v1017_v21, %v1013_v20 }
 0x53a   :  { %v2979_v4 = vadd.f32 %v1019_v22, %v2828_v59  ;;  %v3014_v59 = vld [vmem:[#allocation6 + $0xd0] sm:$0xff] }
 0x53c   :  { %1088 = vmatmul.mubr.f32.vlgmr.msra.gmra.mxu0 %v2979_v4  ;;  %1973 = vmatmul.mubr.f32.vlgmr.msra.gmra.mxu1 %v2979_v4 }
 0x53d   :  { %1206 = vmatpush1.msra.mxu0 %v2832_v42  ;;  %1976 = vmatpush3.msra.mxu1 %v2835_v43 }
 0x53e   :  { %1207 = vmatprep.subr.mxu0 %v2838_v52  ;;  %1977 = vmatprep.subr.mxu1 %v3189_v0 }
 0x53f   :  { %1208 = vmatpush1.msra.mxu0 %v2842_v63  ;;  %1978 = vmatpush3.msra.mxu1 %v2845_v2 }
 0x540   :  { %1209 = vmatprep.subr.mxu0 %v2848_v45  ;;  %1979 = vmatprep.subr.mxu1 %v3189_v0 }
 0x541   :  { %1210 = vmatpush1.msra.mxu0 %v2852_v57  ;;  %1980 = vmatpush3.msra.mxu1 %v2855_v54 }
 0x542   :  { %1211 = vmatprep.subr.mxu0 %v2858_v53  ;;  %1981 = vmatprep.subr.mxu1 %v3189_v0 }
 0x543   :  { %1212 = vmatpush1.msra.mxu0 %v2862_v56  ;;  %1982 = vmatpush3.msra.mxu1 %v2865_v58 }
 0x544   :  { %1213 = vmatprep.subr.mxu0 %v2868_v60  ;;  %1983 = vmatprep.subr.mxu1 %v3189_v0 }
 0x545   :  { %1214 = vmatpush1.msra.mxu0 %v2872_v62  ;;  %1984 = vmatpush3.msra.mxu1 %v2875_v1 }
 0x546   :  { %1215 = vmatprep.subr.mxu0 %v2878_v17  ;;  %1985 = vmatprep.subr.mxu1 %v3189_v0 }
 0x547   :  { %1216 = vmatpush1.msra.mxu0 %v2882_v48  ;;  %1986 = vmatpush3.msra.mxu1 %v2885_v51 }
 0x548   :  { %1217 = vmatprep.subr.mxu0 %v2888_v46  ;;  %1987 = vmatprep.subr.mxu1 %v3189_v0 }
 0x549   :  { %1218 = vmatpush1.msra.mxu0 %v2892_v61  ;;  %1988 = vmatpush3.msra.mxu1 %v3008_v55 }
 0x54a   :  { %1219 = vmatprep.subr.mxu0 %v2896_v3  ;;  %1989 = vmatprep.subr.mxu1 %v3189_v0 }
 0x54b   :  { %1220 = vmatpush1.msra.mxu0 %v2900_v5  ;;  %1990 = vmatpush3.msra.mxu1 %v3014_v59 }
 0x54c   :  { %1221 = vmatprep.subr.mxu0 %v2904_v6  ;;  %1991 = vmatprep.subr.mxu1 %v3189_v0 }
 0x54d   :  { %1222 = vmatpush1.msra.mxu0 %v2908_v8  ;;  %1992 = vmatpush3.msra.mxu1 %v3020_v18 }
 0x54e   :  { %1223 = vmatprep.subr.mxu0 %v2912_v32  ;;  %1993 = vmatprep.subr.mxu1 %v3189_v0 }
 0x54f   :  { %1224 = vmatpush1.msra.mxu0 %v2916_v9  ;;  %1994 = vmatpush3.msra.mxu1 %v3026_v23 }
 0x550   :  { %1225 = vmatprep.subr.mxu0 %v2920_v35  ;;  %1995 = vmatprep.subr.mxu1 %v3189_v0 }
 0x551   :  { %1226 = vmatpush1.msra.mxu0 %v2924_v10  ;;  %1996 = vmatpush3.msra.mxu1 %v3032_v24 }
 0x552   :  { %1227 = vmatprep.subr.mxu0 %v2928_v38  ;;  %1997 = vmatprep.subr.mxu1 %v3189_v0 }
 0x553   :  { %1228 = vmatpush1.msra.mxu0 %v2932_v11  ;;  %1998 = vmatpush3.msra.mxu1 %v3038_v7 }
 0x554   :  { %1229 = vmatprep.subr.mxu0 %v2936_v41  ;;  %1999 = vmatprep.subr.mxu1 %v3189_v0 }
 0x555   :  { %1230 = vmatpush1.msra.mxu0 %v2940_v12  ;;  %2000 = vmatpush3.msra.mxu1 %v3044_v25 }
 0x556   :  { %1231 = vmatprep.subr.mxu0 %v2944_v44  ;;  %2001 = vmatprep.subr.mxu1 %v3189_v0 }
 0x557   :  { %1232 = vmatpush1.msra.mxu0 %v2948_v13  ;;  %2002 = vmatpush3.msra.mxu1 %v3050_v26 }
 0x558   :  { %1233 = vmatprep.subr.mxu0 %v2952_v47  ;;  %2003 = vmatprep.subr.mxu1 %v3189_v0 }
 0x559   :  { %1234 = vmatpush1.msra.mxu0 %v2956_v14  ;;  %2004 = vmatpush3.msra.mxu1 %v3056_v27 }
 0x55a   :  { %1235 = vmatprep.subr.mxu0 %v2960_v49  ;;  %2005 = vmatprep.subr.mxu1 %v3189_v0 }
 0x55b   :  { %1236 = vmatpush1.msra.mxu0 %v2964_v15  ;;  %1269 = vmatprep.mubr.f32.mxu0 %v3189_v0 }
 0x55c   :  { %2006 = vmatpush3.msra.mxu1 %v3063_v28  ;;  %2007 = vmatprep.mubr.msk.f32.mxu1 %vm2284_vm0, %v3189_v0  ;;  %v3073_v28 = vld [vmem:[%s3163_s4] ss:$0 sm:$0xff]  ;;  %s2286_s4 = smov [#allocation8]  }
 0x55d   :  { %1387 = vmatprep.subr.mxu0 %v2971_v50  ;;  %2010 = vmatprep.subr.mxu1 %v3189_v0  ;;  %v1183_v50 = vrot.slane %v1022_v29, 4  ;;  %s1578_s29 = sshll.u32 %s2286_s4, 4  ;;  %s1579_s29 = int_to_ptr.vmem [resolvable:$true] %s1578_s29 }
 0x55e   :  { %s2229_s30 = scalar_lea.vmem %s1579_s29, 256  ;;  %p2234_p11 = scmp.lt.s32.totalorder %s1579_s29, %s1579_s29 }
 0x55f   :  { %p2230_p10 = scmp.ne.s32.totalorder %s1579_s29, %s2229_s30  ;;  %p2235_p12 = scmp.lt.s32.totalorder %s2229_s30, %s2229_s30 }
 0x561   :  { %p2236_p13 = por %p2235_p12, %p2234_p11 }
 0x563   :  { %p2237_p0 = pnand %p2236_p13, %p2230_p10 }
 0x5fc   :  { %v1089_v30 = vpop.f32.mrf.mxu0  ;;  %v1160_v31 = vpop.f32.mrf.mxu1 }
 0x5fd   :  { %v1164_v33 = vadd.f32 %v1089_v30, %v1022_v29  ;;  %v1181_v30 = vadd.f32 %v3073_v28, %v1160_v31 }
 0x5fe   :  { %v1974_v34 = vpop.f32.mrf.mxu1  ;;  %v1091_v39 = vpop.f32.mrf.mxu0 }
 0x5ff   :  { %v1620_v36 = vmul.f32 -1.442695, %v1164_v33  ;;  %v1174_v40 = vadd.f32 %v1172_v37, %v1091_v39 }
 0x601   :  { %2110 = vpow2.f32 %v1620_v36  ;;  %v1621_v16 = vmul.f32 -1.442695, %v1174_v40 }
 0x603   :  { %2112 = vpow2.f32 %v1621_v16 }
 0x60e   :  { %v2111_v19 = vpop.eup %2110 }
 0x60f   :  { %v1168_v20 = vadd.f32 1.0, %v2111_v19 }
 0x610   :  { %v2113_v21 = vpop.eup %2112 }
 0x611   :  { %2114 = vrcp.f32 %v1168_v20  ;;  %v1178_v22 = vadd.f32 1.0, %v2113_v21  ;;  %v1199_v21 = vpop.permute.xlu1 %1198 }
 0x613   :  { %2116 = vrcp.f32 %v1178_v22 }
 0x61e   :  { %v2115_v33 = vpop.eup %2114 }
 0x61f   :  { %v1182_v34 = vmul.f32 %v2115_v33, %v1181_v30 }
 0x620   :  { %v2117_v37 = vpop.eup %2116 }
 0x621   :  { %v1185_v36 = vadd.f32 %v1183_v50, %v1182_v34  ;;  %v1187_v39 = vsub.f32 1.0, %v2117_v37  ;;  %v1189_v16 = vmul.f32 %v2117_v37, %v2979_v4 }
 0x623   :  { %2118 = vtanh.f32 %v1185_v36 }
 0x630   :  { %v2119_v40 = vpop.eup %2118 }
 0x631   :  { %v1188_v19 = vmul.f32 %v2119_v40, %v1187_v39 }
 0x633   :  { %v1190_v20 = vadd.f32 %v1189_v16, %v1188_v19  ;;  %v1563_v16 = vpop.permute.xlu1 %1562 }
 0x635   :  { %1192 = vst [vmem:[#allocation8 + $0xa] sm:$0x3] %v1190_v20  ;;  %v1195_v29 = vsub.f32 %v1190_v20, %v2979_v4 }
 0x637   :  { %v1201_v15 = vmul.f32 %v1199_v21, %v1195_v29 }
 0x639   :  { %v3079_v49 = vadd.f32 %v1201_v15, %v2979_v4 }
 0x63b   :  { %1270 = vmatmul.mubr.f32.vlgmr.msra.gmra.mxu0 %v3079_v49  ;;  %2008 = vmatmul.mubr.f32.vlgmr.msra.gmra.mxu1 %v3079_v49 }
 0x63c   :  { %1388 = vmatpush1.msra.mxu0 %v2832_v42  ;;  %2011 = vmatpush3.msra.mxu1 %v2835_v43  ;;  %v3208_v42 = vld [vmem:[#allocation16_spill] sm:$0xff]  ;;  %v3209_v43 = vld [vmem:[#allocation19_spill] sm:$0xff] }
 0x63d   :  { %1389 = vmatprep.subr.mxu0 %v2838_v52  ;;  %2012 = vmatprep.subr.mxu1 %v3189_v0  ;;  %v3210_v52 = vld [vmem:[#allocation17_spill] sm:$0xff] }
 0x63e   :  { %1390 = vmatpush1.msra.mxu0 %v2842_v63  ;;  %2013 = vmatpush3.msra.mxu1 %v2845_v2  ;;  %v1204_v63 = vld [vmem:[#allocation3 + $0x24] sm:$0x3f] }
 0x63f   :  { %1391 = vmatprep.subr.mxu0 %v2848_v45  ;;  %2014 = vmatprep.subr.mxu1 %v3189_v0 }
 0x640   :  { %1392 = vmatpush1.msra.mxu0 %v2852_v57  ;;  %2015 = vmatpush3.msra.mxu1 %v2855_v54 }
 0x641   :  { %1393 = vmatprep.subr.mxu0 %v2858_v53  ;;  %2016 = vmatprep.subr.mxu1 %v3189_v0 }
 0x642   :  { %1394 = vmatpush1.msra.mxu0 %v2862_v56  ;;  %2017 = vmatpush3.msra.mxu1 %v2865_v58  ;;  %v1354_v56 = vrot.slane %v1204_v63, 2 }
 0x643   :  { %1395 = vmatprep.subr.mxu0 %v2868_v60  ;;  %2018 = vmatprep.subr.mxu1 %v3189_v0 }
 0x644   :  { %1396 = vmatpush1.msra.mxu0 %v2872_v62  ;;  %2019 = vmatpush3.msra.mxu1 %v2875_v1 }
 0x645   :  { %1397 = vmatprep.subr.mxu0 %v2878_v17  ;;  %2020 = vmatprep.subr.mxu1 %v3189_v0 }
 0x646   :  { %1398 = vmatpush1.msra.mxu0 %v2882_v48  ;;  %2021 = vmatpush3.msra.mxu1 %v2885_v51 }
 0x647   :  { %1399 = vmatprep.subr.mxu0 %v2888_v46  ;;  %2022 = vmatprep.subr.mxu1 %v3189_v0  ;;  %v1365_v46 = vrot.slane %v1204_v63, 4 }
 0x648   :  { %1400 = vmatpush1.msra.mxu0 %v2892_v61  ;;  %2023 = vmatpush3.msra.mxu1 %v3008_v55 }
 0x649   :  { %1401 = vmatprep.subr.mxu0 %v2896_v3  ;;  %2024 = vmatprep.subr.mxu1 %v3189_v0 }
 0x64a   :  { %1402 = vmatpush1.msra.mxu0 %v2900_v5  ;;  %2025 = vmatpush3.msra.mxu1 %v3014_v59 }
 0x64b   :  { %1403 = vmatprep.subr.mxu0 %v2904_v6  ;;  %2026 = vmatprep.subr.mxu1 %v3189_v0 }
 0x64c   :  { %1404 = vmatpush1.msra.mxu0 %v2908_v8  ;;  %2027 = vmatpush3.msra.mxu1 %v3020_v18 }
 0x64d   :  { %1405 = vmatprep.subr.mxu0 %v2912_v32  ;;  %2028 = vmatprep.subr.mxu1 %v3189_v0 }
 0x64e   :  { %1406 = vmatpush1.msra.mxu0 %v2916_v9  ;;  %2029 = vmatpush3.msra.mxu1 %v3026_v23 }
 0x64f   :  { %1407 = vmatprep.subr.mxu0 %v2920_v35  ;;  %2030 = vmatprep.subr.mxu1 %v3189_v0 }
 0x650   :  { %1408 = vmatpush1.msra.mxu0 %v2924_v10  ;;  %2031 = vmatpush3.msra.mxu1 %v3032_v24 }
 0x651   :  { %1409 = vmatprep.subr.mxu0 %v2928_v38  ;;  %2032 = vmatprep.subr.mxu1 %v3189_v0 }
 0x652   :  { %1410 = vmatpush1.msra.mxu0 %v2932_v11  ;;  %2033 = vmatpush3.msra.mxu1 %v3038_v7  ;;  %v1381_v11 = vpop.permute.xlu0 %1380 }
 0x653   :  { %1411 = vmatprep.subr.mxu0 %v2936_v41  ;;  %2034 = vmatprep.subr.mxu1 %v3189_v0 }
 0x654   :  { %1412 = vmatpush1.msra.mxu0 %v2940_v12  ;;  %2035 = vmatpush3.msra.mxu1 %v3044_v25 }
 0x655   :  { %1413 = vmatprep.subr.mxu0 %v2944_v44  ;;  %2036 = vmatprep.subr.mxu1 %v3189_v0  ;;  %v1386_v44 = vld [vmem:[#allocation3 + $0x2a] sm:$0x3f] }
 0x656   :  { %1414 = vmatpush1.msra.mxu0 %v2948_v13  ;;  %2037 = vmatpush3.msra.mxu1 %v3050_v26  ;;  %v1536_v55 = vrot.slane %v1386_v44, 2 }
 0x657   :  { %1415 = vmatprep.subr.mxu0 %v2952_v47  ;;  %2038 = vmatprep.subr.mxu1 %v3189_v0 }
 0x658   :  { %1416 = vmatpush1.msra.mxu0 %v2956_v14  ;;  %2039 = vmatpush3.msra.mxu1 %v3056_v27 }
 0x659   :  { %1417 = vmatprep.subr.mxu0 %v3208_v42  ;;  %2040 = vmatprep.subr.mxu1 %v3189_v0 }
 0x65a   :  { %1418 = vmatpush1.msra.mxu0 %v3209_v43  ;;  %1451 = vmatprep.mubr.f32.mxu0 %v3189_v0 }
 0x65b   :  { %2041 = vmatpush3.msra.mxu1 %v3210_v52  ;;  %2042 = vmatprep.mubr.msk.f32.mxu1 %vm2284_vm0, %v3189_v0 }
 0x6fb   :  { %v1271_v2 = vpop.f32.mrf.mxu0  ;;  %v1342_v45 = vpop.f32.mrf.mxu1 }
 0x6fc   :  { %v1346_v57 = vadd.f32 %v1271_v2, %v1204_v63  ;;  %v1363_v0 = vadd.f32 %v3073_v28, %v1342_v45 }
 0x6fd   :  { %v2009_v54 = vpop.f32.mrf.mxu1  ;;  %v1273_v58 = vpop.f32.mrf.mxu0 }
 0x6fe   :  { %v1623_v53 = vmul.f32 -1.442695, %v1346_v57  ;;  %v1356_v60 = vadd.f32 %v1354_v56, %v1273_v58 }
 0x700   :  { %2120 = vpow2.f32 %v1623_v53  ;;  %v1624_v62 = vmul.f32 -1.442695, %v1356_v60 }
 0x702   :  { %2122 = vpow2.f32 %v1624_v62 }
 0x70d   :  { %v2121_v1 = vpop.eup %2120 }
 0x70e   :  { %v1350_v17 = vadd.f32 1.0, %v2121_v1 }
 0x70f   :  { %v2123_v48 = vpop.eup %2122 }
 0x710   :  { %2124 = vrcp.f32 %v1350_v17  ;;  %v1360_v51 = vadd.f32 1.0, %v2123_v48 }
 0x712   :  { %2126 = vrcp.f32 %v1360_v51 }
 0x71d   :  { %v2125_v61 = vpop.eup %2124 }
 0x71e   :  { %v1364_v3 = vmul.f32 %v2125_v61, %v1363_v0 }
 0x71f   :  { %v2127_v6 = vpop.eup %2126 }
 0x720   :  { %v1367_v5 = vadd.f32 %v1365_v46, %v1364_v3  ;;  %v1369_v8 = vsub.f32 1.0, %v2127_v6  ;;  %v1371_v9 = vmul.f32 %v2127_v6, %v3079_v49 }
 0x722   :  { %2128 = vtanh.f32 %v1367_v5 }
 0x72f   :  { %v2129_v32 = vpop.eup %2128 }
 0x730   :  { %v1370_v35 = vmul.f32 %v2129_v32, %v1369_v8 }
 0x732   :  { %v1372_v10 = vadd.f32 %v1371_v9, %v1370_v35 }
 0x734   :  { %1374 = vst [vmem:[#allocation8 + $0xc] sm:$0x3] %v1372_v10  ;;  %v1377_v38 = vsub.f32 %v1372_v10, %v3079_v49 }
 0x736   :  { %v1383_v41 = vmul.f32 %v1381_v11, %v1377_v38 }
 0x738   :  { %v1384_v12 = vadd.f32 %v1383_v41, %v3079_v49  ;;  %v1547_v49 = vrot.slane %v1386_v44, 4 }
 0x73a   :  { %1452 = vmatmul.mubr.f32.vlgmr.msra.gmra.mxu0 %v1384_v12  ;;  %2043 = vmatmul.mubr.f32.vlgmr.msra.gmra.mxu1 %v1384_v12 }
 0x7fa   :  { %v1453_v13 = vpop.f32.mrf.mxu0  ;;  %v1524_v47 = vpop.f32.mrf.mxu1 }
 0x7fb   :  { %v1528_v14 = vadd.f32 %v1453_v13, %v1386_v44  ;;  %v1545_v27 = vadd.f32 %v3073_v28, %v1524_v47 }
 0x7fc   :  { %v2044_v15 = vpop.f32.mrf.mxu1  ;;  %v1455_v59 = vpop.f32.mrf.mxu0 }
 0x7fd   :  { %v1626_v4 = vmul.f32 -1.442695, %v1528_v14  ;;  %v1538_v18 = vadd.f32 %v1536_v55, %v1455_v59 }
 0x7ff   :  { %2130 = vpow2.f32 %v1626_v4  ;;  %v1627_v23 = vmul.f32 -1.442695, %v1538_v18 }
 0x801   :  { %2132 = vpow2.f32 %v1627_v23 }
 0x80c   :  { %v2131_v24 = vpop.eup %2130 }
 0x80d   :  { %v1532_v7 = vadd.f32 1.0, %v2131_v24 }
 0x80e   :  { %v2133_v25 = vpop.eup %2132 }
 0x80f   :  { %2134 = vrcp.f32 %v1532_v7  ;;  %v1542_v26 = vadd.f32 1.0, %v2133_v25 }
 0x811   :  { %2136 = vrcp.f32 %v1542_v26 }
 0x81c   :  { %v2135_v31 = vpop.eup %2134 }
 0x81d   :  { %v1546_v22 = vmul.f32 %v2135_v31, %v1545_v27 }
 0x81e   :  { %v2137_v30 = vpop.eup %2136 }
 0x81f   :  { %v1549_v50 = vadd.f32 %v1547_v49, %v1546_v22  ;;  %v1551_v33 = vsub.f32 1.0, %v2137_v30  ;;  %v1553_v37 = vmul.f32 %v2137_v30, %v1384_v12 }
 0x821   :  { %2138 = vtanh.f32 %v1549_v50 }
 0x82e   :  { %v2139_v34 = vpop.eup %2138 }
 0x82f   :  { %v1552_v36 = vmul.f32 %v2139_v34, %v1551_v33 }
 0x831   :  { %v1554_v39 = vadd.f32 %v1553_v37, %v1552_v36 }
 0x833   :  { %1556 = vst [vmem:[#allocation8 + $0xe] sm:$0x3] %v1554_v39  ;;  %v1559_v40 = vsub.f32 %v1554_v39, %v1384_v12 }
 0x834   :  { %2240 = shalt.err (!%p2237_p0)
}
 0x835   :  { %s2287_s7 = smov 32   ;;  %s2288_s8 = smov 2   ;;  %v1565_v28 = vmul.f32 %v1563_v16, %v1559_v40 }
 0x836   :  { %1584 = dma.vmem_to_hbm [thread:$0]  %s1579_s29, 256, %s3164_s5, [#allocation5], %s2287_s7, %s2287_s7, %s2288_s8  }
 0x837   :  { %v1566_v19 = vadd.f32 %v1565_v28, %v1384_v12  ;;  %s2289_s0 = smov [#allocation9]  }
 0x838   :  { %s1591_s3 = sshll.u32 %s2289_s0, 4  ;;  %s1592_s3 = int_to_ptr.vmem [resolvable:$true] %s1591_s3 }
 0x839   :  { %1567 = vst [vmem:[#allocation2] sm:$0x3] %v1566_v19  ;;  %s2249_s2 = scalar_lea.vmem %s1592_s3, 32  ;;  %p2254_p2 = scmp.lt.s32.totalorder %s1592_s3, %s1592_s3 }
 0x83a   :  { %p2250_p1 = scmp.ne.s32.totalorder %s1592_s3, %s2249_s2  ;;  %p2255_p3 = scmp.lt.s32.totalorder %s2249_s2, %s2249_s2 }
 0x83c   :  { %p2256_p4 = por %p2255_p3, %p2254_p2 }
 0x83e   :  { %p2257_p5 = pnand %p2256_p4, %p2250_p1 }
 0x840   :  { %v1571_v20 = vld [vmem:[#allocation2] sm:$0x3] }
 0x841   :  { %1572 = vst [vmem:[#allocation9] sm:$0x3] %v1571_v20 }
 0x842   :  { %2260 = shalt.err (!%p2257_p5)
}
 0x843   :  { %1594 = dma.vmem_to_hbm [thread:$0]  %s1592_s3, 32, %s3165_s6, [#allocation10]  }
 0x844   :  { %2273 = dma.done.wait [#allocation5], 256  }
 0x845   :  { %2274 = vsyncadd [#allocation5], 4294967040 }
 0x846   :  { %2275 = dma.done.wait [#allocation10], 32  }
 0x847   :  { %2276 = vsyncadd [#allocation10], 4294967264 }
 0x848   :  { %1601 = vsyncpa [#allocation4], 1 }
 0x849   :  { %1602 = vsyncpa [#allocation7], 1 }
 0x84a   :  { %1603 = vsyncpa [#allocation5], 1 }
 0x84b   :  { %1604 = vsyncpa [#allocation10], 1 }

</bundles_post_ra>
